<compile_context>
chip_gen: v7x
topology: tpu7x:2x2x1
jax: 0.10.0
libtpu: 0.0.40
codegen_flags: <defaults>
</compile_context>

<pallas_src>
import math
import jax
import jax.numpy as jnp
from jax import lax
from jax.experimental import pallas as pl
from jax.experimental.pallas import tpu as pltpu

# ---- DPC_RNN hyper-parameters (small synthetic sizes) ----------------------
B = 2
NUM_SEQ = 8                       # N
SEQ_LEN = 5                       # SL
PRED_STEP = 3
C_IN = 3                          # RGB
SAMPLE_SIZE = 64                  # H = W
FEAT = 32                         # param['feature_size'] (real resnet50 -> 1024)
LAST_SIZE = int(math.ceil(SAMPLE_SIZE / 32))   # 2
LAST_DUR = int(math.ceil(SEQ_LEN / 4))         # 2
L2 = LAST_SIZE * LAST_SIZE
P_ROWS = B * L2                   # pixel rows per time step
N_CTX = NUM_SEQ - PRED_STEP       # context steps fed to the ConvGRU
M_ROWS = PRED_STEP * P_ROWS       # rows of pred / feature_inf (= 24)

_VMEM = pl.BlockSpec(memory_space=pltpu.MemorySpace.VMEM)


# ----------------------------- fused Pallas kernel ---------------------------
def _dpc_fused_kernel(x_ref, wbb_ref, bbb_ref,
                      wx_ref, wh_ref, woh_ref, ball_ref,
                      w1_ref, b1_ref, w2_ref, b2_ref,
                      score_ref):
    """Fused backbone-proj -> ConvGRU aggregation -> prediction loop -> score.

    x_ref:     (NUM_SEQ * P_ROWS, C_IN) pooled pixels, rows ordered (n, b, l2)
    score_ref: (M_ROWS, M_ROWS), rows/cols ordered (pred_step, b, l2)
    """
    f = FEAT
    p = P_ROWS

    # ---- hoisted weight loads and bias broadcasts (outside all loops) ------
    x_all = x_ref[...]                               # (N*P, C_IN)
    wbb = wbb_ref[...]                               # (C_IN, F)
    wx = wx_ref[...]                                 # (F, 3F)  [r|u|o] x-gates
    wh = wh_ref[...]                                 # (F, 2F)  [r|u]   h-gates
    woh = woh_ref[...]                               # (F, F)   out h-gate
    w1 = w1_ref[...]                                 # network_pred conv1
    w2 = w2_ref[...]                                 # network_pred conv2
    ball = jnp.broadcast_to(ball_ref[...], (p, 3 * f))
    b1b = jnp.broadcast_to(b1_ref[...], (p, f))
    b2b = jnp.broadcast_to(b2_ref[...], (p, f))

    # ---- backbone 1x1 channel projection: C_IN(=3) VPU broadcast FMAs ------
    # (an MXU dot with contraction dim 3 would use ~2% of the array width)
    rows = x_all.shape[0]
    feat = jnp.broadcast_to(bbb_ref[...], (rows, f))
    for c in range(C_IN):
        feat = feat + x_all[:, c:c + 1] * wbb[c:c + 1, :]
    feat_relu = jnp.maximum(feat, 0.0)               # relu(feature) -> GRU input
    feat_inf = feat[N_CTX * p:, :]                   # pre-ReLU "feature_inf"

    # ---- ConvGRU cell (kernel_size=1 -> per-pixel GRU), gate-packed --------
    def gru_cell(x, h):
        gx = jnp.dot(x, wx, preferred_element_type=jnp.float32) + ball   # (P,3F)
        gh = jnp.dot(h, wh, preferred_element_type=jnp.float32)          # (P,2F)
        reset = jax.nn.sigmoid(gx[:, 0:f] + gh[:, 0:f])
        update = jax.nn.sigmoid(gx[:, f:2 * f] + gh[:, f:2 * f])
        out = jnp.tanh(gx[:, 2 * f:3 * f]
                       + jnp.dot(h * reset, woh,
                                 preferred_element_type=jnp.float32))
        return h * (1.0 - update) + out * update

    # ---- aggregate context with the ConvGRU (static unroll, 5 steps) -------
    hidden = jnp.zeros((p, f), jnp.float32)
    for t in range(N_CTX):
        hidden = gru_cell(feat_relu[t * p:(t + 1) * p, :], hidden)

    # ---- predict pred_step future steps + score (static unroll, 3 steps) ---
    for s in range(PRED_STEP):
        t1 = jnp.maximum(
            jnp.dot(hidden, w1, preferred_element_type=jnp.float32) + b1b, 0.0)
        p_tmp = jnp.dot(t1, w2, preferred_element_type=jnp.float32) + b2b
        # score rows of this prediction step: pred_s @ feature_inf^T
        # (transpose-free contraction over the last axes of both operands)
        score_ref[s * p:(s + 1) * p, :] = lax.dot_general(
            p_tmp, feat_inf, (((1,), (1,)), ((), ())),
            preferred_element_type=jnp.float32)
        hidden = gru_cell(jnp.maximum(p_tmp, 0.0), hidden)


def dpc_fused(x2d, params):
    g = params["gru"]
    pr = params["pred"]
    bb = params["backbone"]
    return pl.pallas_call(
        _dpc_fused_kernel,
        out_shape=jax.ShapeDtypeStruct((M_ROWS, M_ROWS), jnp.float32),
        in_specs=[_VMEM] * 11,
        out_specs=_VMEM,
    )(x2d, bb["w"], bb["b"],
      g["wx_all"], g["wh_ru"], g["wo_h"], g["b_all"],
      pr["w1"], pr["b1"], pr["w2"], pr["b2"])


# ------------------------------- parameters ----------------------------------
def init_params(key):
    # TODO(synk): nn.init.orthogonal_ replaced by deterministic scaled-normal init.
    ks = jax.random.split(key, 6)

    def w(k, shape):
        return (jax.random.normal(k, shape, jnp.float32)
                / jnp.sqrt(jnp.float32(shape[0])))

    f = FEAT
    zeros_b = jnp.zeros((1, f), jnp.float32)       # biases init to 0 (as in module)
    # Per-gate ConvGRU 1x1-conv weights over cat([x, h]) -> (2F, F) each,
    # packed lane-wise for the 3-push gate computation inside the kernel.
    wr = w(ks[1], (2 * f, f))
    wu = w(ks[2], (2 * f, f))
    wo = w(ks[3], (2 * f, f))
    return {
        "backbone": {"w": w(ks[0], (C_IN, f)), "b": zeros_b},
        "gru": {
            "wx_all": jnp.concatenate([wr[:f], wu[:f], wo[:f]], axis=1),  # (F,3F)
            "wh_ru": jnp.concatenate([wr[f:], wu[f:]], axis=1),           # (F,2F)
            "wo_h": wo[f:],                                               # (F,F)
            "b_all": jnp.zeros((1, 3 * f), jnp.float32),                  # [br|bu|bo]
        },
        "pred": {"w1": w(ks[4], (f, f)), "b1": zeros_b,
                 "w2": w(ks[5], (f, f)), "b2": zeros_b},
    }


# ------------------------------- mask (glue) ----------------------------------
def build_mask(b):
    # Matches the PyTorch mask: note that the reference reassigns N = pred_step
    # before building the mask, so positives sit at nn == p (same b, same l2).
    b1 = jnp.arange(b).reshape(b, 1, 1, 1, 1, 1)
    p = jnp.arange(PRED_STEP).reshape(1, PRED_STEP, 1, 1, 1, 1)
    s1 = jnp.arange(L2).reshape(1, 1, L2, 1, 1, 1)
    b2 = jnp.arange(b).reshape(1, 1, 1, b, 1, 1)
    nn_ = jnp.arange(PRED_STEP).reshape(1, 1, 1, 1, PRED_STEP, 1)
    s2 = jnp.arange(L2).reshape(1, 1, 1, 1, 1, L2)
    same_b = (b1 == b2)
    same_bs = same_b & (s1 == s2)
    pos = same_bs & (nn_ == p)
    mask = jnp.zeros((b, PRED_STEP, L2, b, PRED_STEP, L2), jnp.int32)
    mask = jnp.where(same_b, -3, mask)    # spatial negatives (same batch)
    mask = jnp.where(same_bs, -1, mask)   # temporal negatives (same batch+loc)
    mask = jnp.where(pos, 1, mask)        # positives
    return mask.astype(jnp.int8)


# ------------------------------- forward --------------------------------------
def dpc_rnn_forward(block, params):
    # block: (B, N, C, SL, H, W) float32   (PyTorch convention)
    b, n, c, sl, hgt, wid = block.shape

    # TODO(synk): full resnet50-2d3d backbone not implemented; stand-in =
    # spatial avg-pool /32 + temporal ceil(/4) group avg + avg_pool3d over the
    # remaining last_duration frames; the 1x1x1 channel projection runs inside
    # the fused Pallas kernel.
    xs = block.reshape(b, n, c, sl, LAST_SIZE, hgt // LAST_SIZE,
                       LAST_SIZE, wid // LAST_SIZE).mean(axis=(5, 7))
    groups = [xs[:, :, :, 4 * d:min(4 * (d + 1), sl)].mean(axis=3)
              for d in range(LAST_DUR)]
    pooled = jnp.stack(groups, axis=3).mean(axis=3)          # (B, N, C, Ls, Ls)

    # channels-last pixel matrix, rows ordered (n, b, l2)
    x2d = pooled.transpose(1, 0, 3, 4, 2).reshape(n * b * L2, c)

    # single fused Pallas kernel: projection + GRU agg + pred loop + score
    score_pb = dpc_fused(x2d, params)                        # (PS*B*L2, PS*B*L2)

    # kernel emits rows/cols in (pred_step, b, l2) order; rearrange (tiny 24x24)
    # to the module's (B, PS, L2, B, PS, L2) score layout.
    score = (score_pb.reshape(PRED_STEP, b, L2, PRED_STEP, b, L2)
                     .transpose(1, 0, 2, 4, 3, 5))
    mask = build_mask(b)
    return score, mask


if __name__ == "__main__":
    key = jax.random.PRNGKey(0)
    k_block, k_params = jax.random.split(key)
    block = jax.random.normal(
        k_block, (B, NUM_SEQ, C_IN, SEQ_LEN, SAMPLE_SIZE, SAMPLE_SIZE),
        jnp.float32)
    params = init_params(k_params)

    fwd = jax.jit(dpc_rnn_forward)
    score, mask = fwd(block, params)
    jax.block_until_ready((score, mask))

    assert score.shape == (B, PRED_STEP, L2, B, PRED_STEP, L2)
    assert score.dtype == jnp.float32
    assert mask.shape == (B, PRED_STEP, L2, B, PRED_STEP, L2)
    assert mask.dtype == jnp.int8
    print("KERNEL_OK")
</pallas_src>

<mosaic_0001>
module attributes {stable_mosaic.version = 11 : i64} {
  func.func @_dpc_fused_kernel(%arg0: memref<64x3xf32, #tpu.memory_space<vmem>>, %arg1: memref<3x32xf32, #tpu.memory_space<vmem>>, %arg2: memref<1x32xf32, #tpu.memory_space<vmem>>, %arg3: memref<32x96xf32, #tpu.memory_space<vmem>>, %arg4: memref<32x64xf32, #tpu.memory_space<vmem>>, %arg5: memref<32x32xf32, #tpu.memory_space<vmem>>, %arg6: memref<1x96xf32, #tpu.memory_space<vmem>>, %arg7: memref<32x32xf32, #tpu.memory_space<vmem>>, %arg8: memref<1x32xf32, #tpu.memory_space<vmem>>, %arg9: memref<32x32xf32, #tpu.memory_space<vmem>>, %arg10: memref<1x32xf32, #tpu.memory_space<vmem>>, %arg11: memref<24x24xf32, #tpu.memory_space<vmem>>) attributes {dimension_semantics = [], scalar_prefetch = 0 : i64, scratch_operands = 0 : i64, tpu.core_type = #tpu.core_type<tc>} {
    %c0 = arith.constant 0 : index
    %c0_0 = arith.constant 0 : index
    %0 = vector.load %arg0[%c0, %c0_0] : memref<64x3xf32, #tpu.memory_space<vmem>>, vector<64x3xf32>
    %c0_1 = arith.constant 0 : index
    %c0_2 = arith.constant 0 : index
    %1 = vector.load %arg1[%c0_1, %c0_2] : memref<3x32xf32, #tpu.memory_space<vmem>>, vector<3x32xf32>
    %c0_3 = arith.constant 0 : index
    %c0_4 = arith.constant 0 : index
    %2 = vector.load %arg3[%c0_3, %c0_4] : memref<32x96xf32, #tpu.memory_space<vmem>>, vector<32x96xf32>
    %c0_5 = arith.constant 0 : index
    %c0_6 = arith.constant 0 : index
    %3 = vector.load %arg4[%c0_5, %c0_6] : memref<32x64xf32, #tpu.memory_space<vmem>>, vector<32x64xf32>
    %c0_7 = arith.constant 0 : index
    %c0_8 = arith.constant 0 : index
    %4 = vector.load %arg5[%c0_7, %c0_8] : memref<32x32xf32, #tpu.memory_space<vmem>>, vector<32x32xf32>
    %c0_9 = arith.constant 0 : index
    %c0_10 = arith.constant 0 : index
    %5 = vector.load %arg7[%c0_9, %c0_10] : memref<32x32xf32, #tpu.memory_space<vmem>>, vector<32x32xf32>
    %c0_11 = arith.constant 0 : index
    %c0_12 = arith.constant 0 : index
    %6 = vector.load %arg9[%c0_11, %c0_12] : memref<32x32xf32, #tpu.memory_space<vmem>>, vector<32x32xf32>
    %c0_13 = arith.constant 0 : index
    %c0_14 = arith.constant 0 : index
    %7 = vector.load %arg6[%c0_13, %c0_14] : memref<1x96xf32, #tpu.memory_space<vmem>>, vector<1x96xf32>
    %8 = vector.shape_cast %7 : vector<1x96xf32> to vector<1x96xf32>
    %9 = vector.broadcast %8 : vector<1x96xf32> to vector<8x96xf32>
    %c0_15 = arith.constant 0 : index
    %c0_16 = arith.constant 0 : index
    %10 = vector.load %arg8[%c0_15, %c0_16] : memref<1x32xf32, #tpu.memory_space<vmem>>, vector<1x32xf32>
    %11 = vector.shape_cast %10 : vector<1x32xf32> to vector<1x32xf32>
    %12 = vector.broadcast %11 : vector<1x32xf32> to vector<8x32xf32>
    %c0_17 = arith.constant 0 : index
    %c0_18 = arith.constant 0 : index
    %13 = vector.load %arg10[%c0_17, %c0_18] : memref<1x32xf32, #tpu.memory_space<vmem>>, vector<1x32xf32>
    %14 = vector.shape_cast %13 : vector<1x32xf32> to vector<1x32xf32>
    %15 = vector.broadcast %14 : vector<1x32xf32> to vector<8x32xf32>
    %c0_19 = arith.constant 0 : index
    %c0_20 = arith.constant 0 : index
    %16 = vector.load %arg2[%c0_19, %c0_20] : memref<1x32xf32, #tpu.memory_space<vmem>>, vector<1x32xf32>
    %17 = vector.shape_cast %16 : vector<1x32xf32> to vector<1x32xf32>
    %18 = vector.broadcast %17 : vector<1x32xf32> to vector<64x32xf32>
    %19 = vector.extract_strided_slice %0 {offsets = [0, 0], sizes = [64, 1], strides = [1, 1]} : vector<64x3xf32> to vector<64x1xf32>
    %20 = vector.extract_strided_slice %1 {offsets = [0, 0], sizes = [1, 32], strides = [1, 1]} : vector<3x32xf32> to vector<1x32xf32>
    %21 = vector.broadcast %19 : vector<64x1xf32> to vector<64x32xf32>
    %22 = vector.broadcast %20 : vector<1x32xf32> to vector<64x32xf32>
    %23 = arith.mulf %21, %22 : vector<64x32xf32>
    %24 = arith.addf %18, %23 : vector<64x32xf32>
    %25 = vector.extract_strided_slice %0 {offsets = [0, 1], sizes = [64, 1], strides = [1, 1]} : vector<64x3xf32> to vector<64x1xf32>
    %26 = vector.extract_strided_slice %1 {offsets = [1, 0], sizes = [1, 32], strides = [1, 1]} : vector<3x32xf32> to vector<1x32xf32>
    %27 = vector.broadcast %25 : vector<64x1xf32> to vector<64x32xf32>
    %28 = vector.broadcast %26 : vector<1x32xf32> to vector<64x32xf32>
    %29 = arith.mulf %27, %28 : vector<64x32xf32>
    %30 = arith.addf %24, %29 : vector<64x32xf32>
    %31 = vector.extract_strided_slice %0 {offsets = [0, 2], sizes = [64, 1], strides = [1, 1]} : vector<64x3xf32> to vector<64x1xf32>
    %32 = vector.extract_strided_slice %1 {offsets = [2, 0], sizes = [1, 32], strides = [1, 1]} : vector<3x32xf32> to vector<1x32xf32>
    %33 = vector.broadcast %31 : vector<64x1xf32> to vector<64x32xf32>
    %34 = vector.broadcast %32 : vector<1x32xf32> to vector<64x32xf32>
    %35 = arith.mulf %33, %34 : vector<64x32xf32>
    %36 = arith.addf %30, %35 : vector<64x32xf32>
    %cst = arith.constant 0.000000e+00 : f32
    %37 = vector.broadcast %cst : f32 to vector<64x32xf32>
    %38 = arith.maximumf %36, %37 : vector<64x32xf32>
    %39 = vector.extract_strided_slice %36 {offsets = [40, 0], sizes = [24, 32], strides = [1, 1]} : vector<64x32xf32> to vector<24x32xf32>
    %cst_21 = arith.constant 0.000000e+00 : f32
    %40 = vector.broadcast %cst_21 : f32 to vector<8x32xf32>
    %41 = vector.extract_strided_slice %38 {offsets = [0, 0], sizes = [8, 32], strides = [1, 1]} : vector<64x32xf32> to vector<8x32xf32>
    %cst_22 = arith.constant dense<0.000000e+00> : vector<8x96xf32>
    %42 = tpu.matmul %41, %2, %cst_22 {dimension_numbers = #tpu.dot_dimension_numbers<[1], [0], [0], [1], [0, 0, 1, 1], [], []>} : vector<8x32xf32>, vector<32x96xf32>, vector<8x96xf32> -> vector<8x96xf32>
    %43 = arith.addf %42, %9 : vector<8x96xf32>
    %cst_23 = arith.constant dense<0.000000e+00> : vector<8x64xf32>
    %44 = tpu.matmul %40, %3, %cst_23 {dimension_numbers = #tpu.dot_dimension_numbers<[1], [0], [0], [1], [0, 0, 1, 1], [], []>} : vector<8x32xf32>, vector<32x64xf32>, vector<8x64xf32> -> vector<8x64xf32>
    %45 = vector.extract_strided_slice %43 {offsets = [0, 0], sizes = [8, 32], strides = [1, 1]} : vector<8x96xf32> to vector<8x32xf32>
    %46 = vector.extract_strided_slice %44 {offsets = [0, 0], sizes = [8, 32], strides = [1, 1]} : vector<8x64xf32> to vector<8x32xf32>
    %47 = arith.addf %45, %46 : vector<8x32xf32>
    %48 = arith.negf %47 : vector<8x32xf32>
    %49 = math.exp %48 : vector<8x32xf32>
    %cst_24 = arith.constant 1.000000e+00 : f32
    %50 = vector.broadcast %cst_24 : f32 to vector<8x32xf32>
    %51 = arith.addf %50, %49 : vector<8x32xf32>
    %52 = arith.divf %50, %51 : vector<8x32xf32>
    %53 = vector.extract_strided_slice %43 {offsets = [0, 32], sizes = [8, 32], strides = [1, 1]} : vector<8x96xf32> to vector<8x32xf32>
    %54 = vector.extract_strided_slice %44 {offsets = [0, 32], sizes = [8, 32], strides = [1, 1]} : vector<8x64xf32> to vector<8x32xf32>
    %55 = arith.addf %53, %54 : vector<8x32xf32>
    %56 = arith.negf %55 : vector<8x32xf32>
    %57 = math.exp %56 : vector<8x32xf32>
    %cst_25 = arith.constant 1.000000e+00 : f32
    %58 = vector.broadcast %cst_25 : f32 to vector<8x32xf32>
    %59 = arith.addf %58, %57 : vector<8x32xf32>
    %60 = arith.divf %58, %59 : vector<8x32xf32>
    %61 = vector.extract_strided_slice %43 {offsets = [0, 64], sizes = [8, 32], strides = [1, 1]} : vector<8x96xf32> to vector<8x32xf32>
    %62 = arith.mulf %40, %52 : vector<8x32xf32>
    %cst_26 = arith.constant dense<0.000000e+00> : vector<8x32xf32>
    %63 = tpu.matmul %62, %4, %cst_26 {dimension_numbers = #tpu.dot_dimension_numbers<[1], [0], [0], [1], [0, 0, 1, 1], [], []>} : vector<8x32xf32>, vector<32x32xf32>, vector<8x32xf32> -> vector<8x32xf32>
    %64 = arith.addf %61, %63 : vector<8x32xf32>
    %65 = math.tanh %64 : vector<8x32xf32>
    %cst_27 = arith.constant 1.000000e+00 : f32
    %66 = vector.broadcast %cst_27 : f32 to vector<8x32xf32>
    %67 = arith.subf %66, %60 : vector<8x32xf32>
    %68 = arith.mulf %40, %67 : vector<8x32xf32>
    %69 = arith.mulf %65, %60 : vector<8x32xf32>
    %70 = arith.addf %68, %69 : vector<8x32xf32>
    %71 = vector.extract_strided_slice %38 {offsets = [8, 0], sizes = [8, 32], strides = [1, 1]} : vector<64x32xf32> to vector<8x32xf32>
    %cst_28 = arith.constant dense<0.000000e+00> : vector<8x96xf32>
    %72 = tpu.matmul %71, %2, %cst_28 {dimension_numbers = #tpu.dot_dimension_numbers<[1], [0], [0], [1], [0, 0, 1, 1], [], []>} : vector<8x32xf32>, vector<32x96xf32>, vector<8x96xf32> -> vector<8x96xf32>
    %73 = arith.addf %72, %9 : vector<8x96xf32>
    %cst_29 = arith.constant dense<0.000000e+00> : vector<8x64xf32>
    %74 = tpu.matmul %70, %3, %cst_29 {dimension_numbers = #tpu.dot_dimension_numbers<[1], [0], [0], [1], [0, 0, 1, 1], [], []>} : vector<8x32xf32>, vector<32x64xf32>, vector<8x64xf32> -> vector<8x64xf32>
    %75 = vector.extract_strided_slice %73 {offsets = [0, 0], sizes = [8, 32], strides = [1, 1]} : vector<8x96xf32> to vector<8x32xf32>
    %76 = vector.extract_strided_slice %74 {offsets = [0, 0], sizes = [8, 32], strides = [1, 1]} : vector<8x64xf32> to vector<8x32xf32>
    %77 = arith.addf %75, %76 : vector<8x32xf32>
    %78 = arith.negf %77 : vector<8x32xf32>
    %79 = math.exp %78 : vector<8x32xf32>
    %cst_30 = arith.constant 1.000000e+00 : f32
    %80 = vector.broadcast %cst_30 : f32 to vector<8x32xf32>
    %81 = arith.addf %80, %79 : vector<8x32xf32>
    %82 = arith.divf %80, %81 : vector<8x32xf32>
    %83 = vector.extract_strided_slice %73 {offsets = [0, 32], sizes = [8, 32], strides = [1, 1]} : vector<8x96xf32> to vector<8x32xf32>
    %84 = vector.extract_strided_slice %74 {offsets = [0, 32], sizes = [8, 32], strides = [1, 1]} : vector<8x64xf32> to vector<8x32xf32>
    %85 = arith.addf %83, %84 : vector<8x32xf32>
    %86 = arith.negf %85 : vector<8x32xf32>
    %87 = math.exp %86 : vector<8x32xf32>
    %cst_31 = arith.constant 1.000000e+00 : f32
    %88 = vector.broadcast %cst_31 : f32 to vector<8x32xf32>
    %89 = arith.addf %88, %87 : vector<8x32xf32>
    %90 = arith.divf %88, %89 : vector<8x32xf32>
    %91 = vector.extract_strided_slice %73 {offsets = [0, 64], sizes = [8, 32], strides = [1, 1]} : vector<8x96xf32> to vector<8x32xf32>
    %92 = arith.mulf %70, %82 : vector<8x32xf32>
    %cst_32 = arith.constant dense<0.000000e+00> : vector<8x32xf32>
    %93 = tpu.matmul %92, %4, %cst_32 {dimension_numbers = #tpu.dot_dimension_numbers<[1], [0], [0], [1], [0, 0, 1, 1], [], []>} : vector<8x32xf32>, vector<32x32xf32>, vector<8x32xf32> -> vector<8x32xf32>
    %94 = arith.addf %91, %93 : vector<8x32xf32>
    %95 = math.tanh %94 : vector<8x32xf32>
    %cst_33 = arith.constant 1.000000e+00 : f32
    %96 = vector.broadcast %cst_33 : f32 to vector<8x32xf32>
    %97 = arith.subf %96, %90 : vector<8x32xf32>
    %98 = arith.mulf %70, %97 : vector<8x32xf32>
    %99 = arith.mulf %95, %90 : vector<8x32xf32>
    %100 = arith.addf %98, %99 : vector<8x32xf32>
    %101 = vector.extract_strided_slice %38 {offsets = [16, 0], sizes = [8, 32], strides = [1, 1]} : vector<64x32xf32> to vector<8x32xf32>
    %cst_34 = arith.constant dense<0.000000e+00> : vector<8x96xf32>
    %102 = tpu.matmul %101, %2, %cst_34 {dimension_numbers = #tpu.dot_dimension_numbers<[1], [0], [0], [1], [0, 0, 1, 1], [], []>} : vector<8x32xf32>, vector<32x96xf32>, vector<8x96xf32> -> vector<8x96xf32>
    %103 = arith.addf %102, %9 : vector<8x96xf32>
    %cst_35 = arith.constant dense<0.000000e+00> : vector<8x64xf32>
    %104 = tpu.matmul %100, %3, %cst_35 {dimension_numbers = #tpu.dot_dimension_numbers<[1], [0], [0], [1], [0, 0, 1, 1], [], []>} : vector<8x32xf32>, vector<32x64xf32>, vector<8x64xf32> -> vector<8x64xf32>
    %105 = vector.extract_strided_slice %103 {offsets = [0, 0], sizes = [8, 32], strides = [1, 1]} : vector<8x96xf32> to vector<8x32xf32>
    %106 = vector.extract_strided_slice %104 {offsets = [0, 0], sizes = [8, 32], strides = [1, 1]} : vector<8x64xf32> to vector<8x32xf32>
    %107 = arith.addf %105, %106 : vector<8x32xf32>
    %108 = arith.negf %107 : vector<8x32xf32>
    %109 = math.exp %108 : vector<8x32xf32>
    %cst_36 = arith.constant 1.000000e+00 : f32
    %110 = vector.broadcast %cst_36 : f32 to vector<8x32xf32>
    %111 = arith.addf %110, %109 : vector<8x32xf32>
    %112 = arith.divf %110, %111 : vector<8x32xf32>
    %113 = vector.extract_strided_slice %103 {offsets = [0, 32], sizes = [8, 32], strides = [1, 1]} : vector<8x96xf32> to vector<8x32xf32>
    %114 = vector.extract_strided_slice %104 {offsets = [0, 32], sizes = [8, 32], strides = [1, 1]} : vector<8x64xf32> to vector<8x32xf32>
    %115 = arith.addf %113, %114 : vector<8x32xf32>
    %116 = arith.negf %115 : vector<8x32xf32>
    %117 = math.exp %116 : vector<8x32xf32>
    %cst_37 = arith.constant 1.000000e+00 : f32
    %118 = vector.broadcast %cst_37 : f32 to vector<8x32xf32>
    %119 = arith.addf %118, %117 : vector<8x32xf32>
    %120 = arith.divf %118, %119 : vector<8x32xf32>
    %121 = vector.extract_strided_slice %103 {offsets = [0, 64], sizes = [8, 32], strides = [1, 1]} : vector<8x96xf32> to vector<8x32xf32>
    %122 = arith.mulf %100, %112 : vector<8x32xf32>
    %cst_38 = arith.constant dense<0.000000e+00> : vector<8x32xf32>
    %123 = tpu.matmul %122, %4, %cst_38 {dimension_numbers = #tpu.dot_dimension_numbers<[1], [0], [0], [1], [0, 0, 1, 1], [], []>} : vector<8x32xf32>, vector<32x32xf32>, vector<8x32xf32> -> vector<8x32xf32>
    %124 = arith.addf %121, %123 : vector<8x32xf32>
    %125 = math.tanh %124 : vector<8x32xf32>
    %cst_39 = arith.constant 1.000000e+00 : f32
    %126 = vector.broadcast %cst_39 : f32 to vector<8x32xf32>
    %127 = arith.subf %126, %120 : vector<8x32xf32>
    %128 = arith.mulf %100, %127 : vector<8x32xf32>
    %129 = arith.mulf %125, %120 : vector<8x32xf32>
    %130 = arith.addf %128, %129 : vector<8x32xf32>
    %131 = vector.extract_strided_slice %38 {offsets = [24, 0], sizes = [8, 32], strides = [1, 1]} : vector<64x32xf32> to vector<8x32xf32>
    %cst_40 = arith.constant dense<0.000000e+00> : vector<8x96xf32>
    %132 = tpu.matmul %131, %2, %cst_40 {dimension_numbers = #tpu.dot_dimension_numbers<[1], [0], [0], [1], [0, 0, 1, 1], [], []>} : vector<8x32xf32>, vector<32x96xf32>, vector<8x96xf32> -> vector<8x96xf32>
    %133 = arith.addf %132, %9 : vector<8x96xf32>
    %cst_41 = arith.constant dense<0.000000e+00> : vector<8x64xf32>
    %134 = tpu.matmul %130, %3, %cst_41 {dimension_numbers = #tpu.dot_dimension_numbers<[1], [0], [0], [1], [0, 0, 1, 1], [], []>} : vector<8x32xf32>, vector<32x64xf32>, vector<8x64xf32> -> vector<8x64xf32>
    %135 = vector.extract_strided_slice %133 {offsets = [0, 0], sizes = [8, 32], strides = [1, 1]} : vector<8x96xf32> to vector<8x32xf32>
    %136 = vector.extract_strided_slice %134 {offsets = [0, 0], sizes = [8, 32], strides = [1, 1]} : vector<8x64xf32> to vector<8x32xf32>
    %137 = arith.addf %135, %136 : vector<8x32xf32>
    %138 = arith.negf %137 : vector<8x32xf32>
    %139 = math.exp %138 : vector<8x32xf32>
    %cst_42 = arith.constant 1.000000e+00 : f32
    %140 = vector.broadcast %cst_42 : f32 to vector<8x32xf32>
    %141 = arith.addf %140, %139 : vector<8x32xf32>
    %142 = arith.divf %140, %141 : vector<8x32xf32>
    %143 = vector.extract_strided_slice %133 {offsets = [0, 32], sizes = [8, 32], strides = [1, 1]} : vector<8x96xf32> to vector<8x32xf32>
    %144 = vector.extract_strided_slice %134 {offsets = [0, 32], sizes = [8, 32], strides = [1, 1]} : vector<8x64xf32> to vector<8x32xf32>
    %145 = arith.addf %143, %144 : vector<8x32xf32>
    %146 = arith.negf %145 : vector<8x32xf32>
    %147 = math.exp %146 : vector<8x32xf32>
    %cst_43 = arith.constant 1.000000e+00 : f32
    %148 = vector.broadcast %cst_43 : f32 to vector<8x32xf32>
    %149 = arith.addf %148, %147 : vector<8x32xf32>
    %150 = arith.divf %148, %149 : vector<8x32xf32>
    %151 = vector.extract_strided_slice %133 {offsets = [0, 64], sizes = [8, 32], strides = [1, 1]} : vector<8x96xf32> to vector<8x32xf32>
    %152 = arith.mulf %130, %142 : vector<8x32xf32>
    %cst_44 = arith.constant dense<0.000000e+00> : vector<8x32xf32>
    %153 = tpu.matmul %152, %4, %cst_44 {dimension_numbers = #tpu.dot_dimension_numbers<[1], [0], [0], [1], [0, 0, 1, 1], [], []>} : vector<8x32xf32>, vector<32x32xf32>, vector<8x32xf32> -> vector<8x32xf32>
    %154 = arith.addf %151, %153 : vector<8x32xf32>
    %155 = math.tanh %154 : vector<8x32xf32>
    %cst_45 = arith.constant 1.000000e+00 : f32
    %156 = vector.broadcast %cst_45 : f32 to vector<8x32xf32>
    %157 = arith.subf %156, %150 : vector<8x32xf32>
    %158 = arith.mulf %130, %157 : vector<8x32xf32>
    %159 = arith.mulf %155, %150 : vector<8x32xf32>
    %160 = arith.addf %158, %159 : vector<8x32xf32>
    %161 = vector.extract_strided_slice %38 {offsets = [32, 0], sizes = [8, 32], strides = [1, 1]} : vector<64x32xf32> to vector<8x32xf32>
    %cst_46 = arith.constant dense<0.000000e+00> : vector<8x96xf32>
    %162 = tpu.matmul %161, %2, %cst_46 {dimension_numbers = #tpu.dot_dimension_numbers<[1], [0], [0], [1], [0, 0, 1, 1], [], []>} : vector<8x32xf32>, vector<32x96xf32>, vector<8x96xf32> -> vector<8x96xf32>
    %163 = arith.addf %162, %9 : vector<8x96xf32>
    %cst_47 = arith.constant dense<0.000000e+00> : vector<8x64xf32>
    %164 = tpu.matmul %160, %3, %cst_47 {dimension_numbers = #tpu.dot_dimension_numbers<[1], [0], [0], [1], [0, 0, 1, 1], [], []>} : vector<8x32xf32>, vector<32x64xf32>, vector<8x64xf32> -> vector<8x64xf32>
    %165 = vector.extract_strided_slice %163 {offsets = [0, 0], sizes = [8, 32], strides = [1, 1]} : vector<8x96xf32> to vector<8x32xf32>
    %166 = vector.extract_strided_slice %164 {offsets = [0, 0], sizes = [8, 32], strides = [1, 1]} : vector<8x64xf32> to vector<8x32xf32>
    %167 = arith.addf %165, %166 : vector<8x32xf32>
    %168 = arith.negf %167 : vector<8x32xf32>
    %169 = math.exp %168 : vector<8x32xf32>
    %cst_48 = arith.constant 1.000000e+00 : f32
    %170 = vector.broadcast %cst_48 : f32 to vector<8x32xf32>
    %171 = arith.addf %170, %169 : vector<8x32xf32>
    %172 = arith.divf %170, %171 : vector<8x32xf32>
    %173 = vector.extract_strided_slice %163 {offsets = [0, 32], sizes = [8, 32], strides = [1, 1]} : vector<8x96xf32> to vector<8x32xf32>
    %174 = vector.extract_strided_slice %164 {offsets = [0, 32], sizes = [8, 32], strides = [1, 1]} : vector<8x64xf32> to vector<8x32xf32>
    %175 = arith.addf %173, %174 : vector<8x32xf32>
    %176 = arith.negf %175 : vector<8x32xf32>
    %177 = math.exp %176 : vector<8x32xf32>
    %cst_49 = arith.constant 1.000000e+00 : f32
    %178 = vector.broadcast %cst_49 : f32 to vector<8x32xf32>
    %179 = arith.addf %178, %177 : vector<8x32xf32>
    %180 = arith.divf %178, %179 : vector<8x32xf32>
    %181 = vector.extract_strided_slice %163 {offsets = [0, 64], sizes = [8, 32], strides = [1, 1]} : vector<8x96xf32> to vector<8x32xf32>
    %182 = arith.mulf %160, %172 : vector<8x32xf32>
    %cst_50 = arith.constant dense<0.000000e+00> : vector<8x32xf32>
    %183 = tpu.matmul %182, %4, %cst_50 {dimension_numbers = #tpu.dot_dimension_numbers<[1], [0], [0], [1], [0, 0, 1, 1], [], []>} : vector<8x32xf32>, vector<32x32xf32>, vector<8x32xf32> -> vector<8x32xf32>
    %184 = arith.addf %181, %183 : vector<8x32xf32>
    %185 = math.tanh %184 : vector<8x32xf32>
    %cst_51 = arith.constant 1.000000e+00 : f32
    %186 = vector.broadcast %cst_51 : f32 to vector<8x32xf32>
    %187 = arith.subf %186, %180 : vector<8x32xf32>
    %188 = arith.mulf %160, %187 : vector<8x32xf32>
    %189 = arith.mulf %185, %180 : vector<8x32xf32>
    %190 = arith.addf %188, %189 : vector<8x32xf32>
    %cst_52 = arith.constant dense<0.000000e+00> : vector<8x32xf32>
    %191 = tpu.matmul %190, %5, %cst_52 {dimension_numbers = #tpu.dot_dimension_numbers<[1], [0], [0], [1], [0, 0, 1, 1], [], []>} : vector<8x32xf32>, vector<32x32xf32>, vector<8x32xf32> -> vector<8x32xf32>
    %192 = arith.addf %191, %12 : vector<8x32xf32>
    %cst_53 = arith.constant 0.000000e+00 : f32
    %193 = vector.broadcast %cst_53 : f32 to vector<8x32xf32>
    %194 = arith.maximumf %192, %193 : vector<8x32xf32>
    %cst_54 = arith.constant dense<0.000000e+00> : vector<8x32xf32>
    %195 = tpu.matmul %194, %6, %cst_54 {dimension_numbers = #tpu.dot_dimension_numbers<[1], [0], [0], [1], [0, 0, 1, 1], [], []>} : vector<8x32xf32>, vector<32x32xf32>, vector<8x32xf32> -> vector<8x32xf32>
    %196 = arith.addf %195, %15 : vector<8x32xf32>
    %cst_55 = arith.constant dense<0.000000e+00> : vector<8x24xf32>
    %197 = tpu.matmul %196, %39, %cst_55 {dimension_numbers = #tpu.dot_dimension_numbers<[1], [1], [0], [0], [0, 0, 1, 0], [], []>} : vector<8x32xf32>, vector<24x32xf32>, vector<8x24xf32> -> vector<8x24xf32>
    %c0_56 = arith.constant 0 : index
    %c0_57 = arith.constant 0 : index
    %198 = vector.load %arg11[%c0_56, %c0_57] : memref<24x24xf32, #tpu.memory_space<vmem>>, vector<8x24xf32>
    tpu.vector_store %arg11[%c0_56, %c0_57], %197 {strides = array<i32>} : memref<24x24xf32, #tpu.memory_space<vmem>>, vector<8x24xf32>,
    %cst_58 = arith.constant 0.000000e+00 : f32
    %199 = vector.broadcast %cst_58 : f32 to vector<8x32xf32>
    %200 = arith.maximumf %196, %199 : vector<8x32xf32>
    %cst_59 = arith.constant dense<0.000000e+00> : vector<8x96xf32>
    %201 = tpu.matmul %200, %2, %cst_59 {dimension_numbers = #tpu.dot_dimension_numbers<[1], [0], [0], [1], [0, 0, 1, 1], [], []>} : vector<8x32xf32>, vector<32x96xf32>, vector<8x96xf32> -> vector<8x96xf32>
    %202 = arith.addf %201, %9 : vector<8x96xf32>
    %cst_60 = arith.constant dense<0.000000e+00> : vector<8x64xf32>
    %203 = tpu.matmul %190, %3, %cst_60 {dimension_numbers = #tpu.dot_dimension_numbers<[1], [0], [0], [1], [0, 0, 1, 1], [], []>} : vector<8x32xf32>, vector<32x64xf32>, vector<8x64xf32> -> vector<8x64xf32>
    %204 = vector.extract_strided_slice %202 {offsets = [0, 0], sizes = [8, 32], strides = [1, 1]} : vector<8x96xf32> to vector<8x32xf32>
    %205 = vector.extract_strided_slice %203 {offsets = [0, 0], sizes = [8, 32], strides = [1, 1]} : vector<8x64xf32> to vector<8x32xf32>
    %206 = arith.addf %204, %205 : vector<8x32xf32>
    %207 = arith.negf %206 : vector<8x32xf32>
    %208 = math.exp %207 : vector<8x32xf32>
    %cst_61 = arith.constant 1.000000e+00 : f32
    %209 = vector.broadcast %cst_61 : f32 to vector<8x32xf32>
    %210 = arith.addf %209, %208 : vector<8x32xf32>
    %211 = arith.divf %209, %210 : vector<8x32xf32>
    %212 = vector.extract_strided_slice %202 {offsets = [0, 32], sizes = [8, 32], strides = [1, 1]} : vector<8x96xf32> to vector<8x32xf32>
    %213 = vector.extract_strided_slice %203 {offsets = [0, 32], sizes = [8, 32], strides = [1, 1]} : vector<8x64xf32> to vector<8x32xf32>
    %214 = arith.addf %212, %213 : vector<8x32xf32>
    %215 = arith.negf %214 : vector<8x32xf32>
    %216 = math.exp %215 : vector<8x32xf32>
    %cst_62 = arith.constant 1.000000e+00 : f32
    %217 = vector.broadcast %cst_62 : f32 to vector<8x32xf32>
    %218 = arith.addf %217, %216 : vector<8x32xf32>
    %219 = arith.divf %217, %218 : vector<8x32xf32>
    %220 = vector.extract_strided_slice %202 {offsets = [0, 64], sizes = [8, 32], strides = [1, 1]} : vector<8x96xf32> to vector<8x32xf32>
    %221 = arith.mulf %190, %211 : vector<8x32xf32>
    %cst_63 = arith.constant dense<0.000000e+00> : vector<8x32xf32>
    %222 = tpu.matmul %221, %4, %cst_63 {dimension_numbers = #tpu.dot_dimension_numbers<[1], [0], [0], [1], [0, 0, 1, 1], [], []>} : vector<8x32xf32>, vector<32x32xf32>, vector<8x32xf32> -> vector<8x32xf32>
    %223 = arith.addf %220, %222 : vector<8x32xf32>
    %224 = math.tanh %223 : vector<8x32xf32>
    %cst_64 = arith.constant 1.000000e+00 : f32
    %225 = vector.broadcast %cst_64 : f32 to vector<8x32xf32>
    %226 = arith.subf %225, %219 : vector<8x32xf32>
    %227 = arith.mulf %190, %226 : vector<8x32xf32>
    %228 = arith.mulf %224, %219 : vector<8x32xf32>
    %229 = arith.addf %227, %228 : vector<8x32xf32>
    %cst_65 = arith.constant dense<0.000000e+00> : vector<8x32xf32>
    %230 = tpu.matmul %229, %5, %cst_65 {dimension_numbers = #tpu.dot_dimension_numbers<[1], [0], [0], [1], [0, 0, 1, 1], [], []>} : vector<8x32xf32>, vector<32x32xf32>, vector<8x32xf32> -> vector<8x32xf32>
    %231 = arith.addf %230, %12 : vector<8x32xf32>
    %cst_66 = arith.constant 0.000000e+00 : f32
    %232 = vector.broadcast %cst_66 : f32 to vector<8x32xf32>
    %233 = arith.maximumf %231, %232 : vector<8x32xf32>
    %cst_67 = arith.constant dense<0.000000e+00> : vector<8x32xf32>
    %234 = tpu.matmul %233, %6, %cst_67 {dimension_numbers = #tpu.dot_dimension_numbers<[1], [0], [0], [1], [0, 0, 1, 1], [], []>} : vector<8x32xf32>, vector<32x32xf32>, vector<8x32xf32> -> vector<8x32xf32>
    %235 = arith.addf %234, %15 : vector<8x32xf32>
    %cst_68 = arith.constant dense<0.000000e+00> : vector<8x24xf32>
    %236 = tpu.matmul %235, %39, %cst_68 {dimension_numbers = #tpu.dot_dimension_numbers<[1], [1], [0], [0], [0, 0, 1, 0], [], []>} : vector<8x32xf32>, vector<24x32xf32>, vector<8x24xf32> -> vector<8x24xf32>
    %c8 = arith.constant 8 : index
    %c0_69 = arith.constant 0 : index
    %237 = vector.load %arg11[%c8, %c0_69] : memref<24x24xf32, #tpu.memory_space<vmem>>, vector<8x24xf32>
    tpu.vector_store %arg11[%c8, %c0_69], %236 {strides = array<i32>} : memref<24x24xf32, #tpu.memory_space<vmem>>, vector<8x24xf32>,
    %cst_70 = arith.constant 0.000000e+00 : f32
    %238 = vector.broadcast %cst_70 : f32 to vector<8x32xf32>
    %239 = arith.maximumf %235, %238 : vector<8x32xf32>
    %cst_71 = arith.constant dense<0.000000e+00> : vector<8x96xf32>
    %240 = tpu.matmul %239, %2, %cst_71 {dimension_numbers = #tpu.dot_dimension_numbers<[1], [0], [0], [1], [0, 0, 1, 1], [], []>} : vector<8x32xf32>, vector<32x96xf32>, vector<8x96xf32> -> vector<8x96xf32>
    %241 = arith.addf %240, %9 : vector<8x96xf32>
    %cst_72 = arith.constant dense<0.000000e+00> : vector<8x64xf32>
    %242 = tpu.matmul %229, %3, %cst_72 {dimension_numbers = #tpu.dot_dimension_numbers<[1], [0], [0], [1], [0, 0, 1, 1], [], []>} : vector<8x32xf32>, vector<32x64xf32>, vector<8x64xf32> -> vector<8x64xf32>
    %243 = vector.extract_strided_slice %241 {offsets = [0, 0], sizes = [8, 32], strides = [1, 1]} : vector<8x96xf32> to vector<8x32xf32>
    %244 = vector.extract_strided_slice %242 {offsets = [0, 0], sizes = [8, 32], strides = [1, 1]} : vector<8x64xf32> to vector<8x32xf32>
    %245 = arith.addf %243, %244 : vector<8x32xf32>
    %246 = arith.negf %245 : vector<8x32xf32>
    %247 = math.exp %246 : vector<8x32xf32>
    %cst_73 = arith.constant 1.000000e+00 : f32
    %248 = vector.broadcast %cst_73 : f32 to vector<8x32xf32>
    %249 = arith.addf %248, %247 : vector<8x32xf32>
    %250 = arith.divf %248, %249 : vector<8x32xf32>
    %251 = vector.extract_strided_slice %241 {offsets = [0, 32], sizes = [8, 32], strides = [1, 1]} : vector<8x96xf32> to vector<8x32xf32>
    %252 = vector.extract_strided_slice %242 {offsets = [0, 32], sizes = [8, 32], strides = [1, 1]} : vector<8x64xf32> to vector<8x32xf32>
    %253 = arith.addf %251, %252 : vector<8x32xf32>
    %254 = arith.negf %253 : vector<8x32xf32>
    %255 = math.exp %254 : vector<8x32xf32>
    %cst_74 = arith.constant 1.000000e+00 : f32
    %256 = vector.broadcast %cst_74 : f32 to vector<8x32xf32>
    %257 = arith.addf %256, %255 : vector<8x32xf32>
    %258 = arith.divf %256, %257 : vector<8x32xf32>
    %259 = vector.extract_strided_slice %241 {offsets = [0, 64], sizes = [8, 32], strides = [1, 1]} : vector<8x96xf32> to vector<8x32xf32>
    %260 = arith.mulf %229, %250 : vector<8x32xf32>
    %cst_75 = arith.constant dense<0.000000e+00> : vector<8x32xf32>
    %261 = tpu.matmul %260, %4, %cst_75 {dimension_numbers = #tpu.dot_dimension_numbers<[1], [0], [0], [1], [0, 0, 1, 1], [], []>} : vector<8x32xf32>, vector<32x32xf32>, vector<8x32xf32> -> vector<8x32xf32>
    %262 = arith.addf %259, %261 : vector<8x32xf32>
    %263 = math.tanh %262 : vector<8x32xf32>
    %cst_76 = arith.constant 1.000000e+00 : f32
    %264 = vector.broadcast %cst_76 : f32 to vector<8x32xf32>
    %265 = arith.subf %264, %258 : vector<8x32xf32>
    %266 = arith.mulf %229, %265 : vector<8x32xf32>
    %267 = arith.mulf %263, %258 : vector<8x32xf32>
    %268 = arith.addf %266, %267 : vector<8x32xf32>
    %cst_77 = arith.constant dense<0.000000e+00> : vector<8x32xf32>
    %269 = tpu.matmul %268, %5, %cst_77 {dimension_numbers = #tpu.dot_dimension_numbers<[1], [0], [0], [1], [0, 0, 1, 1], [], []>} : vector<8x32xf32>, vector<32x32xf32>, vector<8x32xf32> -> vector<8x32xf32>
    %270 = arith.addf %269, %12 : vector<8x32xf32>
    %cst_78 = arith.constant 0.000000e+00 : f32
    %271 = vector.broadcast %cst_78 : f32 to vector<8x32xf32>
    %272 = arith.maximumf %270, %271 : vector<8x32xf32>
    %cst_79 = arith.constant dense<0.000000e+00> : vector<8x32xf32>
    %273 = tpu.matmul %272, %6, %cst_79 {dimension_numbers = #tpu.dot_dimension_numbers<[1], [0], [0], [1], [0, 0, 1, 1], [], []>} : vector<8x32xf32>, vector<32x32xf32>, vector<8x32xf32> -> vector<8x32xf32>
    %274 = arith.addf %273, %15 : vector<8x32xf32>
    %cst_80 = arith.constant dense<0.000000e+00> : vector<8x24xf32>
    %275 = tpu.matmul %274, %39, %cst_80 {dimension_numbers = #tpu.dot_dimension_numbers<[1], [1], [0], [0], [0, 0, 1, 0], [], []>} : vector<8x32xf32>, vector<24x32xf32>, vector<8x24xf32> -> vector<8x24xf32>
    %c16 = arith.constant 16 : index
    %c0_81 = arith.constant 0 : index
    %276 = vector.load %arg11[%c16, %c0_81] : memref<24x24xf32, #tpu.memory_space<vmem>>, vector<8x24xf32>
    tpu.vector_store %arg11[%c16, %c0_81], %275 {strides = array<i32>} : memref<24x24xf32, #tpu.memory_space<vmem>>, vector<8x24xf32>,
    return
  }
}

</mosaic_0001>

<bundles_post_ra>
// kernel: dpc_rnn_forward.1
= control target key start
LH: loop header
LB: loop body
LE: loop exit
PB: predicated region body
PF: predicated region fallthrough
CT: control target
= control target key end

     0   :  { %v3444_v0 = vmov 0   ;;  %v3445_v2 = vmov 2   ;;  %v3446_v5 = vmov 0.0|0.0   ;;  %v3447_v7 = vmov 1   ;;  %s3452_s28 = smov 96   ;;  %s4020_s0 = inlined_call_operand.vmem [shape: f32[64,3], index: 0, kind: input, shape index: {}]   ;;  %s4021_s3 = inlined_call_operand.vmem [shape: f32[32,96], index: 3, kind: input, shape index: {}]   ;;  %s4022_s1 = inlined_call_operand.vmem [shape: f32[3,32], index: 1, kind: input, shape index: {}]   ;;  %s4023_s2 = inlined_call_operand.vmem [shape: f32[1,32], index: 2, kind: input, shape index: {}]   ;;  %s4024_s4 = inlined_call_operand.vmem [shape: f32[32,64], index: 4, kind: input, shape index: {}]   ;;  %s4025_s5 = inlined_call_operand.vmem [shape: f32[32,32], index: 5, kind: input, shape index: {}]   ;;  %s4026_s6 = inlined_call_operand.vmem [shape: f32[1,96], index: 6, kind: input, shape index: {}]   ;;  %s4027_s7 = inlined_call_operand.vmem [shape: f32[32,32], index: 7, kind: input, shape index: {}]   ;;  %s4028_s9 = inlined_call_operand.vmem [shape: f32[32,32], index: 9, kind: input, shape index: {}]   ;;  %s4029_s8 = inlined_call_operand.vmem [shape: f32[1,32], index: 8, kind: input, shape index: {}]   ;;  %s4030_s10 = inlined_call_operand.vmem [shape: f32[1,32], index: 10, kind: input, shape index: {}]   ;;  %s4031_s11 = inlined_call_operand.vmem [shape: f32[24,24], index: 11, kind: output, shape index: {}]  }
   0x1   :  { %3382 = vset.pattern.permute.xlu0 %v3444_v0  ;;  %v38_v1 = vld [vmem:[%s4020_s0] sm:$0xff]  ;;  %3384 = vset.pattern.permute.xlu1 %v3445_v2  ;;  %v48_v4 = vld [vmem:[%s4021_s3 + $0x8] sm:$0xff]  ;;  %v49_v8 = vld [vmem:[%s4021_s3 + $0x10] sm:$0xff]  ;;  %vm3448_vm0 = vmmov 0   ;;  %v3449_v11 = vmov 0.0   ;;  %v135_v12 = vlaneseq  ;;  %vm264_vm1 = vcmask 261120  }
   0x2   :  { %97 = vperm.xlu0 %3382, %v38_v1   ;;  %208 = vperm.xlu1 %3384, %v38_v1   ;;  %v47_v3 = vld [vmem:[%s4021_s3] sm:$0xff]  ;;  %v50_v9 = vld [vmem:[%s4021_s3 + $0x18] sm:$0xff]  ;;  %v52_v31 = vld [vmem:[%s4024_s4 + $0x8] sm:$0xff]  ;;  %vm1737_vm3 = vcmask 195584  }
   0x3   :  { %3199 = vmatprep.subr.bf16.mxu1 %v3446_v5  ;;  %v3525_v6 = vpack.c.bf16 %v48_v4, %v47_v3  ;;  %3211 = vmatprep.subr.bf16.mxu0 %v3446_v5  ;;  %v3538_v10 = vpack.c.bf16 %v50_v9, %v49_v8  ;;  %v136_v13 = vshrl.u32 %v135_v12, 7  ;;  %v46_v15 = vld [vmem:[%s4022_s1] sm:$0x7]  ;;  %v53_v35 = vld [vmem:[%s4024_s4 + $0x10] sm:$0xff]  ;;  %v54_v36 = vld [vmem:[%s4024_s4 + $0x18] sm:$0xff] }
   0x4   :  { %2883 = vmatprep.mubr.msk.f32.mxu1 %vm3448_vm0, %v3449_v11  ;;  %2905 = vmatprep.mubr.msk.f32.mxu0 %vm3448_vm0, %v3449_v11  ;;  %v3559_v23 = vld [vmem:[%s4023_s2] ss:$0 sm:$0xff]  ;;  %v3580_v37 = vpack.c.bf16 %v54_v36, %v53_v35  ;;  %v56_v39 = vld [vmem:[%s4025_s5 + $0x8] sm:$0xff]  ;;  %v57_v40 = vld [vmem:[%s4025_s5 + $0x10] sm:$0xff] }
   0x5   :  { %3201 = vmatpush3.bf16.msra.mxu1 %v3525_v6  ;;  %v137_v14 = vsub.s32 0, %v136_v13  ;;  %v189_v17 = vsub.s32 1, %v136_v13  ;;  %v241_v18 = vsub.s32 2, %v136_v13  ;;  %v51_v30 = vld [vmem:[%s4024_s4] sm:$0xff]  ;;  %v58_v42 = vld [vmem:[%s4025_s5 + $0x18] sm:$0xff]  ;;  %v39_v58 = vld [vmem:[%s4020_s0 + $0x8] sm:$0xff] }
   0x6   :  { %3383 = vset.pattern.permute.xlu0 %v3447_v7  ;;  %3385 = vset.pattern.permute.xlu1 %v3444_v0  ;;  %v3570_v33 = vpack.c.bf16 %v52_v31, %v51_v30  ;;  %v55_v38 = vld [vmem:[%s4025_s5] sm:$0xff]  ;;  %v3609_v43 = vpack.c.bf16 %v58_v42, %v57_v40  ;;  %s3450_s5 = smov 64   ;;  %vm3877_vm2 = vmpackc.low %vm264_vm1, %vm264_vm1 }
   0x7   :  { %156 = vperm.xlu0 %3383, %v38_v1   ;;  %3202 = vmatprep.subr.bf16.mxu1 %v3446_v5  ;;  %v3549_v16 = vrot.slane %v46_v15, %v137_v14  ;;  %v3552_v21 = vrot.slane %v46_v15, %v189_v17  ;;  %v3554_v22 = vrot.slane %v46_v15, %v241_v18  ;;  %v3617_v46 = vld [vmem:[%s4026_s6] ss:$0 sm:$0xff]  ;;  %s3451_s6 = smov 32  }
   0x8   :  { %v3603_v41 = vpack.c.bf16 %v56_v39, %v55_v38 }
   0x9   :  { %3204 = vmatpush3.bf16.msra.mxu1 %v3538_v10 }
   0xa   :  { %3205 = vmatprep.subr.bf16.mxu1 %v3446_v5  ;;  %3213 = vmatpush3.bf16.msra.mxu0 %v3603_v41 }
   0xb   :  { %3214 = vmatprep.subr.bf16.mxu0 %v3446_v5 }
   0xe   :  { %3216 = vmatpush3.bf16.msra.mxu0 %v3609_v43 }
   0xf   :  { %3223 = vmatprep.subr.bf16.mxu0 %v3446_v5 }
  0x81   :  { %v98_v19 = vpop.permute.xlu0 %97  ;;  %v209_v24 = vpop.permute.xlu1 %208 }
  0x82   :  { %v139_v20 = vmul.f32 %v3549_v16, %v98_v19  ;;  %v243_v28 = vmul.f32 %v3554_v22, %v209_v24 }
  0x84   :  { %v147_v26 = vadd.f32 %v3559_v23, %v139_v20 }
  0x86   :  { %v157_v25 = vpop.permute.xlu0 %156 }
  0x87   :  { %v191_v27 = vmul.f32 %v3552_v21, %v157_v25 }
  0x89   :  { %v199_v29 = vadd.f32 %v191_v27, %v147_v26 }
  0x8b   :  { %v251_v32 = vadd.f32 %v243_v28, %v199_v29 }
  0x8d   :  { %v259_v34 = vmax.f32 %v251_v32, 0.0 }
  0x8f   :  { %2884 = vmatmul.mubr.msk.f32.vlgmr.msra.gmra.mrb[0].mxu1 %vm264_vm1, %v259_v34 }
  0x90   :  { %3207 = vmatpush3.bf16.msra.mxu1 %v3570_v33  ;;  %2894 = vmatprep.mubr.msk.f32.mxu1 %vm3448_vm0, %v3449_v11 }
  0x91   :  { %3208 = vmatprep.subr.bf16.mxu1 %v3446_v5 }
  0x94   :  { %3210 = vmatpush3.bf16.msra.mxu1 %v3580_v37 }
  0x95   :  { %3217 = vmatprep.subr.bf16.mxu1 %v3446_v5 }
  0x97   :  { %2895 = vmatmul.mubr.f32.vlgmr.msra.gmra.mrb[2].mxu1 %v3449_v11 }
  0x98   :  { %3219 = vmatpush3.bf16.msra.mxu1 %v3525_v6  ;;  %2916 = vmatprep.mubr.msk.f32.mxu1 %vm3448_vm0, %v3449_v11 }
  0x99   :  { %3220 = vmatprep.subr.bf16.mxu1 %v3446_v5 }
  0x9c   :  { %3222 = vmatpush3.bf16.msra.mxu1 %v3538_v10 }
  0x9d   :  { %3229 = vmatprep.subr.bf16.mxu1 %v3446_v5 }
 0x162   :  { %v334_v44 = vpop.f32.mrb[0].mxu1 }
 0x163   :  { %v2885_v45 = vpop.f32.mrb[1].mxu1  ;;  %v335_v47 = vadd.f32 %v3617_v46, %v334_v44 }
 0x164   :  { %v40_v45 = vld [vmem:[%s4020_s0 + $0x10] sm:$0xff] }
 0x16a   :  { %v407_v48 = vpop.f32.mrb[2].mxu1 }
 0x16b   :  { %v411_v49 = vadd.f32 %v407_v48, %v335_v47  ;;  %v2896_v50 = vpop.f32.mrb[3].mxu1 }
 0x16d   :  { %v2684_v51 = vmul.f32 -1.442695, %v411_v49 }
 0x16f   :  { %3402 = vpow2.f32 %v2684_v51 }
 0x179   :  { %v3403_v52 = vpop.eup %3402 }
 0x17a   :  { %v415_v53 = vadd.f32 1.0, %v3403_v52 }
 0x17c   :  { %3404 = vrcp.f32 %v415_v53 }
 0x186   :  { %v3405_v54 = vpop.eup %3404 }
 0x187   :  { %v418_v55 = vmul.f32 0.0, %v3405_v54  ;;  %v498_v1 = vsub.f32 1.0, %v3405_v54 }
 0x189   :  { %2906 = vmatmul.mubr.msk.f32.vlgmr.msra.gmra.mrb[0].mxu0 %vm264_vm1, %v418_v55  ;;  %v499_v3 = vmul.f32 0.0, %v498_v1 }
 0x18a   :  { %3225 = vmatpush3.bf16.msra.mxu0 %v3570_v33  ;;  %2927 = vmatprep.mubr.msk.f32.mxu0 %vm3448_vm0, %v3449_v11 }
 0x18b   :  { %3226 = vmatprep.subr.bf16.mxu0 %v3446_v5 }
 0x18e   :  { %3228 = vmatpush3.bf16.msra.mxu0 %v3580_v37 }
 0x18f   :  { %3235 = vmatprep.subr.bf16.mxu0 %v3446_v5 }
 0x25c   :  { %v488_v56 = vpop.f32.mrb[0].mxu0 }
 0x25d   :  { %493 = vrot.lane.b32.xlu1 %v488_v56, %s3450_s5  ;;  %v2907_v57 = vpop.f32.mrb[1].mxu0 }
 0x261   :  { %501 = vrot.lane.b32.xlu1 %v3405_v54, %s3451_s6 }
 0x265   :  { %102 = vperm.xlu1 %3385, %v39_v58  }
 0x269   :  { %3386 = vset.pattern.permute.xlu1 %v3445_v2 }
 0x26a   :  { %212 = vperm.xlu1 %3386, %v39_v58  }
 0x26e   :  { %3387 = vset.pattern.permute.xlu1 %v3444_v0 }
 0x2cf   :  { %v494_v59 = vpop.permute.xlu1 %493 }
 0x2d0   :  { %v496_v60 = vadd.f32 %v494_v59, %v335_v47 }
 0x2d2   :  { %3406 = vtanh.f32 %v496_v60 }
 0x2d3   :  { %v502_v62 = vpop.permute.xlu1 %501 }
 0x2dc   :  { %v3407_v61 = vpop.eup %3406 }
 0x2dd   :  { %v504_v63 = vmul.f32 %v3407_v61, %v502_v62 }
 0x2df   :  { %506 = vrot.lane.b32.xlu0 %v504_v63, %s3452_s28 }
 0x2e3   :  { %160 = vperm.xlu0 %3383, %v39_v58  }
 0x2e4   :  { %v103_v9 = vpop.permute.xlu1 %102 }
 0x2e5   :  { %v140_v12 = vmul.f32 %v3549_v16, %v103_v9 }
 0x2e7   :  { %v148_v14 = vadd.f32 %v3559_v23, %v140_v12 }
 0x2e9   :  { %v213_v13 = vpop.permute.xlu1 %212 }
 0x2ea   :  { %v244_v18 = vmul.f32 %v3554_v22, %v213_v13 }
 0x351   :  { %v507_v4 = vpop.permute.xlu0 %506 }
 0x352   :  { %v3635_v8 = vadd.f32 %v507_v4, %v499_v3 }
 0x354   :  { %584 = vrot.lane.b32.xlu0 %v3635_v8, %s3452_s28 }
 0x362   :  { %v161_v15 = vpop.permute.xlu0 %160 }
 0x363   :  { %v192_v17 = vmul.f32 %v3552_v21, %v161_v15 }
 0x365   :  { %v200_v19 = vadd.f32 %v192_v17, %v148_v14 }
 0x367   :  { %v252_v20 = vadd.f32 %v244_v18, %v200_v19 }
 0x369   :  { %v260_v24 = vmax.f32 %v252_v20, 0.0 }
 0x36b   :  { %2917 = vmatmul.mubr.msk.f32.vlgmr.msra.gmra.mrb[4].mxu1 %vm264_vm1, %v260_v24 }
 0x36c   :  { %3231 = vmatpush3.bf16.msra.mxu1 %v3603_v41  ;;  %2938 = vmatprep.mubr.msk.f32.mxu1 %vm3448_vm0, %v3449_v11 }
 0x36d   :  { %3232 = vmatprep.subr.bf16.mxu1 %v3446_v5 }
 0x370   :  { %3234 = vmatpush3.bf16.msra.mxu1 %v3609_v43 }
 0x371   :  { %3241 = vmatprep.subr.bf16.mxu1 %v3446_v5 }
 0x3c6   :  { %v585_v25 = vpop.permute.xlu0 %584 }
 0x3c7   :  { %2928 = vmatmul.mubr.msk.f32.vlgmr.msra.gmra.mrb[2].mxu0 %vm264_vm1, %v585_v25 }
 0x3c8   :  { %3237 = vmatpush3.bf16.msra.mxu0 %v3525_v6  ;;  %2949 = vmatprep.mubr.msk.f32.mxu0 %vm3448_vm0, %v3449_v11 }
 0x3c9   :  { %3238 = vmatprep.subr.bf16.mxu0 %v3446_v5 }
 0x3cc   :  { %3240 = vmatpush3.bf16.msra.mxu0 %v3538_v10 }
 0x3cd   :  { %3247 = vmatprep.subr.bf16.mxu0 %v3446_v5 }
 0x43e   :  { %v579_v26 = vpop.f32.mrb[4].mxu1 }
 0x43f   :  { %v2918_v27 = vpop.f32.mrb[5].mxu1  ;;  %v580_v28 = vadd.f32 %v3617_v46, %v579_v26 }
 0x49a   :  { %v654_v29 = vpop.f32.mrb[2].mxu0 }
 0x49b   :  { %v658_v30 = vadd.f32 %v654_v29, %v580_v28  ;;  %v2929_v31 = vpop.f32.mrb[3].mxu0 }
 0x49d   :  { %v2688_v32 = vmul.f32 -1.442695, %v658_v30 }
 0x49f   :  { %3408 = vpow2.f32 %v2688_v32 }
 0x4a9   :  { %v3409_v34 = vpop.eup %3408 }
 0x4aa   :  { %v662_v35 = vadd.f32 1.0, %v3409_v34 }
 0x4ac   :  { %3410 = vrcp.f32 %v662_v35 }
 0x4b6   :  { %v3411_v36 = vpop.eup %3410 }
 0x4b7   :  { %666 = vrot.lane.b32.xlu1 %v3411_v36, %s3451_s6  ;;  %v751_v51 = vsub.f32 1.0, %v3411_v36 }
 0x4b9   :  { %v752_v52 = vmul.f32 %v751_v51, %v3635_v8 }
 0x529   :  { %v667_v38 = vpop.permute.xlu1 %666 }
 0x52a   :  { %v669_v39 = vmul.f32 %v667_v38, %v3635_v8 }
 0x52c   :  { %671 = vrot.lane.b32.xlu0 %v669_v39, %s3452_s28 }
 0x59e   :  { %v672_v40 = vpop.permute.xlu0 %671 }
 0x59f   :  { %2939 = vmatmul.mubr.msk.f32.vlgmr.msra.gmra.mrb[6].mxu1 %vm264_vm1, %v672_v40 }
 0x5a0   :  { %3243 = vmatpush3.bf16.msra.mxu1 %v3570_v33  ;;  %2960 = vmatprep.mubr.msk.f32.mxu1 %vm3448_vm0, %v3449_v11 }
 0x5a1   :  { %3244 = vmatprep.subr.bf16.mxu1 %v3446_v5 }
 0x5a4   :  { %3246 = vmatpush3.bf16.msra.mxu1 %v3580_v37 }
 0x5a5   :  { %3253 = vmatprep.subr.bf16.mxu1 %v3446_v5 }
 0x672   :  { %v741_v42 = vpop.f32.mrb[6].mxu1 }
 0x673   :  { %746 = vrot.lane.b32.xlu1 %v741_v42, %s3450_s5  ;;  %v2940_v44 = vpop.f32.mrb[7].mxu1 }
 0x677   :  { %107 = vperm.xlu1 %3387, %v40_v45  }
 0x67b   :  { %3388 = vset.pattern.permute.xlu1 %v3445_v2 }
 0x67c   :  { %216 = vperm.xlu1 %3388, %v40_v45  }
 0x680   :  { %3389 = vset.pattern.permute.xlu1 %v3444_v0 }
 0x6e5   :  { %v747_v47 = vpop.permute.xlu1 %746 }
 0x6e6   :  { %v749_v48 = vadd.f32 %v747_v47, %v580_v28  ;;  %v41_v28 = vld [vmem:[%s4020_s0 + $0x18] sm:$0xff] }
 0x6e8   :  { %3412 = vtanh.f32 %v749_v48 }
 0x6f2   :  { %v3413_v49 = vpop.eup %3412 }
 0x6f3   :  { %v753_v50 = vmul.f32 %v3413_v49, %v667_v38 }
 0x6f5   :  { %755 = vrot.lane.b32.xlu0 %v753_v50, %s3452_s28 }
 0x6f6   :  { %v108_v55 = vpop.permute.xlu1 %107 }
 0x6f7   :  { %v141_v56 = vmul.f32 %v3549_v16, %v108_v55 }
 0x6f9   :  { %164 = vperm.xlu0 %3383, %v40_v45   ;;  %v149_v58 = vadd.f32 %v3559_v23, %v141_v56 }
 0x6fb   :  { %v217_v57 = vpop.permute.xlu1 %216 }
 0x6fc   :  { %v245_v61 = vmul.f32 %v3554_v22, %v217_v57 }
 0x767   :  { %v756_v53 = vpop.permute.xlu0 %755 }
 0x768   :  { %v3676_v54 = vadd.f32 %v756_v53, %v752_v52 }
 0x76a   :  { %833 = vrot.lane.b32.xlu0 %v3676_v54, %s3452_s28 }
 0x778   :  { %v165_v59 = vpop.permute.xlu0 %164 }
 0x779   :  { %v193_v60 = vmul.f32 %v3552_v21, %v165_v59 }
 0x77b   :  { %v201_v62 = vadd.f32 %v193_v60, %v149_v58 }
 0x77d   :  { %v253_v63 = vadd.f32 %v245_v61, %v201_v62 }
 0x77f   :  { %v261_v1 = vmax.f32 %v253_v63, 0.0 }
 0x781   :  { %2950 = vmatmul.mubr.msk.f32.vlgmr.msra.gmra.mrb[4].mxu0 %vm264_vm1, %v261_v1 }
 0x782   :  { %3249 = vmatpush3.bf16.msra.mxu0 %v3603_v41  ;;  %2971 = vmatprep.mubr.msk.f32.mxu0 %vm3448_vm0, %v3449_v11 }
 0x783   :  { %3250 = vmatprep.subr.bf16.mxu0 %v3446_v5 }
 0x786   :  { %3252 = vmatpush3.bf16.msra.mxu0 %v3609_v43 }
 0x787   :  { %3259 = vmatprep.subr.bf16.mxu0 %v3446_v5 }
 0x7dc   :  { %v834_v3 = vpop.permute.xlu0 %833 }
 0x7dd   :  { %2961 = vmatmul.mubr.msk.f32.vlgmr.msra.gmra.mrb[8].mxu1 %vm264_vm1, %v834_v3 }
 0x7de   :  { %3255 = vmatpush3.bf16.msra.mxu1 %v3525_v6  ;;  %2982 = vmatprep.mubr.msk.f32.mxu1 %vm3448_vm0, %v3449_v11 }
 0x7df   :  { %3256 = vmatprep.subr.bf16.mxu1 %v3446_v5 }
 0x7e2   :  { %3258 = vmatpush3.bf16.msra.mxu1 %v3538_v10 }
 0x7e3   :  { %3265 = vmatprep.subr.bf16.mxu1 %v3446_v5 }
 0x854   :  { %v828_v4 = vpop.f32.mrb[4].mxu0 }
 0x855   :  { %v2951_v8 = vpop.f32.mrb[5].mxu0  ;;  %v829_v9 = vadd.f32 %v3617_v46, %v828_v4 }
 0x8b0   :  { %v903_v12 = vpop.f32.mrb[8].mxu1 }
 0x8b1   :  { %v907_v13 = vadd.f32 %v903_v12, %v829_v9  ;;  %v2962_v14 = vpop.f32.mrb[9].mxu1 }
 0x8b3   :  { %v2692_v15 = vmul.f32 -1.442695, %v907_v13 }
 0x8b5   :  { %3414 = vpow2.f32 %v2692_v15 }
 0x8bf   :  { %v3415_v17 = vpop.eup %3414 }
 0x8c0   :  { %v911_v18 = vadd.f32 1.0, %v3415_v17 }
 0x8c2   :  { %3416 = vrcp.f32 %v911_v18 }
 0x8cc   :  { %v3417_v19 = vpop.eup %3416 }
 0x8cd   :  { %915 = vrot.lane.b32.xlu1 %v3417_v19, %s3451_s6  ;;  %v1000_v34 = vsub.f32 1.0, %v3417_v19 }
 0x8cf   :  { %v1001_v35 = vmul.f32 %v1000_v34, %v3676_v54 }
 0x93f   :  { %v916_v20 = vpop.permute.xlu1 %915 }
 0x940   :  { %v918_v24 = vmul.f32 %v916_v20, %v3676_v54 }
 0x942   :  { %920 = vrot.lane.b32.xlu0 %v918_v24, %s3452_s28 }
 0x9b4   :  { %v921_v25 = vpop.permute.xlu0 %920 }
 0x9b5   :  { %2972 = vmatmul.mubr.msk.f32.vlgmr.msra.gmra.mrb[6].mxu0 %vm264_vm1, %v921_v25 }
 0x9b6   :  { %3261 = vmatpush3.bf16.msra.mxu0 %v3570_v33  ;;  %2993 = vmatprep.mubr.msk.f32.mxu0 %vm3448_vm0, %v3449_v11 }
 0x9b7   :  { %3262 = vmatprep.subr.bf16.mxu0 %v3446_v5 }
 0x9ba   :  { %3264 = vmatpush3.bf16.msra.mxu0 %v3580_v37 }
 0x9bb   :  { %3271 = vmatprep.subr.bf16.mxu0 %v3446_v5 }
 0xa88   :  { %v990_v26 = vpop.f32.mrb[6].mxu0 }
 0xa89   :  { %995 = vrot.lane.b32.xlu1 %v990_v26, %s3450_s5  ;;  %v2973_v27 = vpop.f32.mrb[7].mxu0 }
 0xa8d   :  { %112 = vperm.xlu1 %3389, %v41_v28  }
 0xa91   :  { %3390 = vset.pattern.permute.xlu1 %v3445_v2 }
 0xa92   :  { %220 = vperm.xlu1 %3390, %v41_v28  }
 0xa96   :  { %3391 = vset.pattern.permute.xlu1 %v3444_v0 }
 0xafb   :  { %v996_v29 = vpop.permute.xlu1 %995 }
 0xafc   :  { %v998_v30 = vadd.f32 %v996_v29, %v829_v9  ;;  %v42_v9 = vld [vmem:[%s4020_s0 + $0x20] sm:$0xff] }
 0xafe   :  { %3418 = vtanh.f32 %v998_v30 }
 0xb08   :  { %v3419_v31 = vpop.eup %3418 }
 0xb09   :  { %v1002_v32 = vmul.f32 %v3419_v31, %v916_v20 }
 0xb0b   :  { %1004 = vrot.lane.b32.xlu0 %v1002_v32, %s3452_s28 }
 0xb0c   :  { %v113_v39 = vpop.permute.xlu1 %112 }
 0xb0d   :  { %v142_v40 = vmul.f32 %v3549_v16, %v113_v39 }
 0xb0f   :  { %168 = vperm.xlu0 %3383, %v41_v28   ;;  %v150_v44 = vadd.f32 %v3559_v23, %v142_v40 }
 0xb11   :  { %v221_v42 = vpop.permute.xlu1 %220 }
 0xb12   :  { %v246_v48 = vmul.f32 %v3554_v22, %v221_v42 }
 0xb7d   :  { %v1005_v36 = vpop.permute.xlu0 %1004 }
 0xb7e   :  { %v3717_v38 = vadd.f32 %v1005_v36, %v1001_v35 }
 0xb80   :  { %1082 = vrot.lane.b32.xlu0 %v3717_v38, %s3452_s28 }
 0xb8e   :  { %v169_v45 = vpop.permute.xlu0 %168 }
 0xb8f   :  { %v194_v47 = vmul.f32 %v3552_v21, %v169_v45 }
 0xb91   :  { %v202_v49 = vadd.f32 %v194_v47, %v150_v44 }
 0xb93   :  { %v254_v50 = vadd.f32 %v246_v48, %v202_v49 }
 0xb95   :  { %v262_v51 = vmax.f32 %v254_v50, 0.0 }
 0xb97   :  { %2983 = vmatmul.mubr.msk.f32.vlgmr.msra.gmra.mrb[10].mxu1 %vm264_vm1, %v262_v51 }
 0xb98   :  { %3267 = vmatpush3.bf16.msra.mxu1 %v3603_v41  ;;  %3004 = vmatprep.mubr.msk.f32.mxu1 %vm3448_vm0, %v3449_v11 }
 0xb99   :  { %3268 = vmatprep.subr.bf16.mxu1 %v3446_v5 }
 0xb9c   :  { %3270 = vmatpush3.bf16.msra.mxu1 %v3609_v43 }
 0xb9d   :  { %3277 = vmatprep.subr.bf16.mxu1 %v3446_v5 }
 0xbf2   :  { %v1083_v52 = vpop.permute.xlu0 %1082 }
 0xbf3   :  { %2994 = vmatmul.mubr.msk.f32.vlgmr.msra.gmra.mrb[8].mxu0 %vm264_vm1, %v1083_v52 }
 0xbf4   :  { %3273 = vmatpush3.bf16.msra.mxu0 %v3525_v6  ;;  %3015 = vmatprep.mubr.msk.f32.mxu0 %vm3448_vm0, %v3449_v11 }
 0xbf5   :  { %3274 = vmatprep.subr.bf16.mxu0 %v3446_v5 }
 0xbf8   :  { %3276 = vmatpush3.bf16.msra.mxu0 %v3538_v10 }
 0xbf9   :  { %3283 = vmatprep.subr.bf16.mxu0 %v3446_v5 }
 0xc6a   :  { %v1077_v53 = vpop.f32.mrb[10].mxu1 }
 0xc6b   :  { %v2984_v54 = vpop.f32.mrb[11].mxu1  ;;  %v1078_v55 = vadd.f32 %v3617_v46, %v1077_v53 }
 0xcc6   :  { %v1152_v56 = vpop.f32.mrb[8].mxu0 }
 0xcc7   :  { %v1156_v57 = vadd.f32 %v1152_v56, %v1078_v55  ;;  %v2995_v58 = vpop.f32.mrb[9].mxu0 }
 0xcc8   :  { %v60_v58 = vld [vmem:[%s4027_s7 + $0x8] sm:$0xff] }
 0xcc9   :  { %v2696_v59 = vmul.f32 -1.442695, %v1156_v57  ;;  %v59_v57 = vld [vmem:[%s4027_s7] sm:$0xff] }
 0xccb   :  { %3420 = vpow2.f32 %v2696_v59  ;;  %v61_v59 = vld [vmem:[%s4027_s7 + $0x10] sm:$0xff] }
 0xcd5   :  { %v3421_v60 = vpop.eup %3420 }
 0xcd6   :  { %v1160_v61 = vadd.f32 1.0, %v3421_v60  ;;  %v3794_v60 = vpack.c.bf16 %v60_v58, %v59_v57 }
 0xcd8   :  { %3422 = vrcp.f32 %v1160_v61  ;;  %v62_v61 = vld [vmem:[%s4027_s7 + $0x18] sm:$0xff] }
 0xce2   :  { %v3423_v62 = vpop.eup %3422 }
 0xce3   :  { %1164 = vrot.lane.b32.xlu1 %v3423_v62, %s3451_s6  ;;  %v1249_v17 = vsub.f32 1.0, %v3423_v62  ;;  %v3800_v62 = vpack.c.bf16 %v62_v61, %v61_v59 }
 0xce5   :  { %v1250_v18 = vmul.f32 %v1249_v17, %v3717_v38  ;;  %v65_v17 = vld [vmem:[%s4028_s9 + $0x10] sm:$0xff] }
 0xd55   :  { %v1165_v63 = vpop.permute.xlu1 %1164 }
 0xd56   :  { %v1167_v1 = vmul.f32 %v1165_v63, %v3717_v38 }
 0xd58   :  { %1169 = vrot.lane.b32.xlu0 %v1167_v1, %s3452_s28 }
 0xdca   :  { %v1170_v3 = vpop.permute.xlu0 %1169 }
 0xdcb   :  { %3005 = vmatmul.mubr.msk.f32.vlgmr.msra.gmra.mrb[12].mxu1 %vm264_vm1, %v1170_v3  ;;  %v63_v3 = vld [vmem:[%s4028_s9] sm:$0xff] }
 0xdcc   :  { %3279 = vmatpush3.bf16.msra.mxu1 %v3570_v33  ;;  %3026 = vmatprep.mubr.msk.f32.mxu1 %vm3448_vm0, %v3449_v11 }
 0xdcd   :  { %3280 = vmatprep.subr.bf16.mxu1 %v3446_v5 }
 0xdd0   :  { %3282 = vmatpush3.bf16.msra.mxu1 %v3580_v37 }
 0xdd1   :  { %3289 = vmatprep.subr.bf16.mxu1 %v3446_v5 }
 0xe9e   :  { %v1239_v4 = vpop.f32.mrb[12].mxu1 }
 0xe9f   :  { %1244 = vrot.lane.b32.xlu1 %v1239_v4, %s3450_s5  ;;  %v3006_v8 = vpop.f32.mrb[13].mxu1  ;;  %v64_v4 = vld [vmem:[%s4028_s9 + $0x8] sm:$0xff] }
 0xea0   :  { %v3812_v8 = vpack.c.bf16 %v64_v4, %v63_v3 }
 0xea3   :  { %117 = vperm.xlu1 %3391, %v42_v9  }
 0xea7   :  { %3392 = vset.pattern.permute.xlu1 %v3445_v2 }
 0xea8   :  { %224 = vperm.xlu1 %3392, %v42_v9  }
 0xeac   :  { %3394 = vset.pattern.permute.xlu1 %v3444_v0 }
 0xf11   :  { %v1245_v12 = vpop.permute.xlu1 %1244 }
 0xf12   :  { %v1247_v13 = vadd.f32 %v1245_v12, %v1078_v55 }
 0xf14   :  { %3424 = vtanh.f32 %v1247_v13 }
 0xf1e   :  { %v3425_v14 = vpop.eup %3424 }
 0xf1f   :  { %v1251_v15 = vmul.f32 %v3425_v14, %v1165_v63 }
 0xf21   :  { %1253 = vrot.lane.b32.xlu0 %v1251_v15, %s3452_s28 }
 0xf22   :  { %v118_v24 = vpop.permute.xlu1 %117 }
 0xf23   :  { %v143_v25 = vmul.f32 %v3549_v16, %v118_v24  ;;  %v43_v24 = vld [vmem:[%s4020_s0 + $0x28] sm:$0xff] }
 0xf25   :  { %172 = vperm.xlu0 %3383, %v42_v9   ;;  %v151_v27 = vadd.f32 %v3559_v23, %v143_v25  ;;  %v45_v25 = vld [vmem:[%s4020_s0 + $0x38] sm:$0xff] }
 0xf27   :  { %v225_v26 = vpop.permute.xlu1 %224 }
 0xf28   :  { %v247_v30 = vmul.f32 %v3554_v22, %v225_v26  ;;  %v3856_v26 = vld [vmem:[%s4029_s8] ss:$0 sm:$0xff] }
 0xf29   :  { %3393 = vset.pattern.permute.xlu0 %v3444_v0 }
 0xf93   :  { %v1254_v19 = vpop.permute.xlu0 %1253 }
 0xf94   :  { %v3759_v20 = vadd.f32 %v1254_v19, %v1250_v18  ;;  %v66_v18 = vld [vmem:[%s4028_s9 + $0x18] sm:$0xff] }
 0xf95   :  { %v3833_v19 = vpack.c.bf16 %v66_v18, %v65_v17 }
 0xf96   :  { %1331 = vrot.lane.b32.xlu0 %v3759_v20, %s3452_s28 }
 0xfa4   :  { %v173_v28 = vpop.permute.xlu0 %172 }
 0xfa5   :  { %v195_v29 = vmul.f32 %v3552_v21, %v173_v28 }
 0xfa7   :  { %v203_v31 = vadd.f32 %v195_v29, %v151_v27 }
 0xfa9   :  { %v255_v32 = vadd.f32 %v247_v30, %v203_v31 }
 0xfab   :  { %v263_v34 = vmax.f32 %v255_v32, 0.0 }
 0xfad   :  { %3016 = vmatmul.mubr.msk.f32.vlgmr.msra.gmra.mrb[10].mxu0 %vm264_vm1, %v263_v34 }
 0xfae   :  { %3285 = vmatpush3.bf16.msra.mxu0 %v3603_v41  ;;  %3037 = vmatprep.mubr.msk.f32.mxu0 %vm3448_vm0, %v3449_v11 }
 0xfaf   :  { %3286 = vmatprep.subr.bf16.mxu0 %v3446_v5 }
 0xfb2   :  { %3288 = vmatpush3.bf16.msra.mxu0 %v3609_v43 }
 0xfb3   :  { %3295 = vmatprep.subr.bf16.mxu0 %v3446_v5 }
0x1008   :  { %v1332_v35 = vpop.permute.xlu0 %1331 }
0x1009   :  { %3027 = vmatmul.mubr.msk.f32.vlgmr.msra.gmra.mrb[14].mxu1 %vm264_vm1, %v1332_v35 }
0x100a   :  { %3048 = vmatprep.mubr.msk.f32.mxu1 %vm3448_vm0, %v3449_v11  ;;  %3291 = vmatpush3.bf16.msra.mxu1 %v3794_v60 }
0x100b   :  { %3292 = vmatprep.subr.bf16.mxu1 %v3446_v5 }
0x100e   :  { %3294 = vmatpush3.bf16.msra.mxu1 %v3800_v62 }
0x100f   :  { %3301 = vmatprep.subr.bf16.mxu1 %v3446_v5 }
0x1080   :  { %v1326_v36 = vpop.f32.mrb[10].mxu0 }
0x1081   :  { %v3017_v38 = vpop.f32.mrb[11].mxu0  ;;  %v1327_v39 = vadd.f32 %v3617_v46, %v1326_v36 }
0x10dc   :  { %v1401_v40 = vpop.f32.mrb[14].mxu1 }
0x10dd   :  { %v1405_v42 = vadd.f32 %v1401_v40, %v1327_v39  ;;  %v3028_v44 = vpop.f32.mrb[15].mxu1 }
0x10df   :  { %v2700_v45 = vmul.f32 -1.442695, %v1405_v42 }
0x10e1   :  { %3426 = vpow2.f32 %v2700_v45 }
0x10eb   :  { %v3427_v47 = vpop.eup %3426 }
0x10ec   :  { %v1409_v48 = vadd.f32 1.0, %v3427_v47 }
0x10ee   :  { %3428 = vrcp.f32 %v1409_v48 }
0x10f8   :  { %v3429_v49 = vpop.eup %3428 }
0x10f9   :  { %1413 = vrot.lane.b32.xlu1 %v3429_v49, %s3451_s6  ;;  %v1498_v9 = vsub.f32 1.0, %v3429_v49 }
0x10fb   :  { %v1499_v12 = vmul.f32 %v1498_v9, %v3759_v20 }
0x116b   :  { %v1414_v50 = vpop.permute.xlu1 %1413 }
0x116c   :  { %v1416_v51 = vmul.f32 %v1414_v50, %v3759_v20  ;;  %v44_v20 = vld [vmem:[%s4020_s0 + $0x30] sm:$0xff] }
0x116e   :  { %1418 = vrot.lane.b32.xlu0 %v1416_v51, %s3452_s28 }
0x11e0   :  { %v1419_v52 = vpop.permute.xlu0 %1418 }
0x11e1   :  { %3038 = vmatmul.mubr.msk.f32.vlgmr.msra.gmra.mrb[12].mxu0 %vm264_vm1, %v1419_v52 }
0x11e2   :  { %3059 = vmatprep.mubr.msk.f32.mxu0 %vm3448_vm0, %v3449_v11  ;;  %3297 = vmatpush3.bf16.msra.mxu0 %v3812_v8 }
0x11e3   :  { %3298 = vmatprep.subr.bf16.mxu0 %v3446_v5 }
0x11e6   :  { %3300 = vmatpush3.bf16.msra.mxu0 %v3833_v19 }
0x11e7   :  { %3305 = vmatprep.subr.bf16.mxu0 %v3446_v5 }
0x12b4   :  { %v1488_v53 = vpop.f32.mrb[12].mxu0 }
0x12b5   :  { %1493 = vrot.lane.b32.xlu1 %v1488_v53, %s3450_s5  ;;  %v3039_v54 = vpop.f32.mrb[13].mxu0 }
0x1327   :  { %v1494_v55 = vpop.permute.xlu1 %1493 }
0x1328   :  { %v1496_v56 = vadd.f32 %v1494_v55, %v1327_v39 }
0x132a   :  { %3430 = vtanh.f32 %v1496_v56 }
0x1334   :  { %v3431_v63 = vpop.eup %3430 }
0x1335   :  { %v1500_v1 = vmul.f32 %v3431_v63, %v1414_v50 }
0x1337   :  { %1502 = vrot.lane.b32.xlu0 %v1500_v1, %s3452_s28 }
0x133b   :  { %122 = vperm.xlu0 %3393, %v43_v24  }
0x133f   :  { %3396 = vset.pattern.permute.xlu0 %v3447_v7 }
0x1340   :  { %180 = vperm.xlu0 %3396, %v44_v20  }
0x1344   :  { %3398 = vset.pattern.permute.xlu0 %v3444_v0 }
0x1345   :  { %132 = vperm.xlu0 %3398, %v45_v25  }
0x1349   :  { %3401 = vset.pattern.permute.xlu0 %v3445_v2 }
0x13a9   :  { %v1503_v13 = vpop.permute.xlu0 %1502 }
0x13aa   :  { %v3817_v14 = vadd.f32 %v1503_v13, %v1499_v12 }
0x13ac   :  { %1507 = vrot.lane.b32.xlu1 %v3817_v14, %s3452_s28 }
0x13b0   :  { %127 = vperm.xlu1 %3394, %v44_v20  }
0x13b4   :  { %3395 = vset.pattern.permute.xlu1 %v3447_v7 }
0x13b5   :  { %176 = vperm.xlu1 %3395, %v43_v24  }
0x13b9   :  { %3397 = vset.pattern.permute.xlu1 %v3445_v2 }
0x13ba   :  { %228 = vperm.xlu1 %3397, %v43_v24   ;;  %v123_v31 = vpop.permute.xlu0 %122 }
0x13be   :  { %232 = vperm.xlu1 %3397, %v44_v20  }
0x13bf   :  { %v181_v34 = vpop.permute.xlu0 %180 }
0x13c0   :  { %v197_v39 = vmul.f32 %v3552_v21, %v181_v34 }
0x13c2   :  { %3399 = vset.pattern.permute.xlu1 %v3447_v7 }
0x13c3   :  { %184 = vperm.xlu1 %3399, %v45_v25  }
0x13c4   :  { %v133_v45 = vpop.permute.xlu0 %132 }
0x13c5   :  { %v146_v51 = vmul.f32 %v3549_v16, %v133_v45 }
0x13c7   :  { %3400 = vset.pattern.permute.xlu1 %v3445_v2  ;;  %v144_v2 = vmul.f32 %v3549_v16, %v123_v31  ;;  %v154_v55 = vadd.f32 %v3559_v23, %v146_v51 }
0x13c8   :  { %236 = vperm.xlu1 %3400, %v45_v25  }
0x13c9   :  { %v152_v36 = vadd.f32 %v3559_v23, %v144_v2 }
0x141e   :  { %v3821_v15 = vpop.permute.xlu1 %1507 }
0x141f   :  { %3049 = vmatmul.mubr.msk.f32.vlgmr.msra.gmra.mrb[16].mxu1 %vm264_vm1, %v3821_v15 }
0x1420   :  { %3068 = vmatprep.mubr.msk.f32.mxu1 %vm3448_vm0, %v3449_v11 }
0x142f   :  { %v128_v30 = vpop.permute.xlu1 %127 }
0x1430   :  { %v145_v7 = vmul.f32 %v3549_v16, %v128_v30 }
0x1432   :  { %v153_v38 = vadd.f32 %v3559_v23, %v145_v7 }
0x1434   :  { %v177_v32 = vpop.permute.xlu1 %176  ;;  %v205_v47 = vadd.f32 %v197_v39, %v153_v38 }
0x1435   :  { %v196_v35 = vmul.f32 %v3552_v21, %v177_v32 }
0x1437   :  { %v204_v42 = vadd.f32 %v196_v35, %v152_v36 }
0x1439   :  { %v229_v40 = vpop.permute.xlu1 %228 }
0x143a   :  { %v248_v44 = vmul.f32 %v3554_v22, %v229_v40 }
0x143c   :  { %v256_v49 = vadd.f32 %v248_v44, %v204_v42 }
0x143d   :  { %v233_v48 = vpop.permute.xlu1 %232 }
0x143e   :  { %v249_v50 = vmul.f32 %v3554_v22, %v233_v48 }
0x1440   :  { %v257_v52 = vadd.f32 %v249_v50, %v205_v47 }
0x1442   :  { %v3881_v54 = vpack.c.bf16 %v257_v52, %v256_v49  ;;  %v185_v56 = vpop.permute.xlu1 %184 }
0x1443   :  { %v198_v57 = vmul.f32 %v3552_v21, %v185_v56  ;;  %v3898_v21 = vld [vmem:[%s4030_s10] ss:$0 sm:$0xff] }
0x1444   :  { %3304 = vmatpush3.bf16.xpose.msk.msra.mxu1 %vm3877_vm2, %v3881_v54 }
0x1445   :  { %3066 = vmatprep.subr.mxu1 %v3449_v11  ;;  %v206_v16 = vadd.f32 %v198_v57, %v154_v55 }
0x1447   :  { %v237_v58 = vpop.permute.xlu1 %236 }
0x1448   :  { %v250_v59 = vmul.f32 %v3554_v22, %v237_v58 }
0x144a   :  { %v3890_v61 = vadd.f32 %v250_v59, %v206_v16 }
0x144c   :  { %3067 = vmatpush3.xpose.msk.msra.mxu1 %vm264_vm1, %v3890_v61 }
0x144d   :  { %3311 = vmatprep.subr.bf16.mxu1 %v3446_v5 }
0x14f2   :  { %v1577_v27 = vpop.f32.mrb[16].mxu1 }
0x14f3   :  { %v1578_v28 = vadd.f32 %v3856_v26, %v1577_v27  ;;  %v3050_v0 = vpop.f32.mrb[17].mxu1 }
0x14f5   :  { %v1581_v29 = vmax.f32 %v1578_v28, 0.0 }
0x14f7   :  { %3060 = vmatmul.mubr.msk.f32.vlgmr.msra.gmra.mrb[14].mxu0 %vm264_vm1, %v1581_v29 }
0x14f8   :  { %3307 = vmatpush3.bf16.msra.mxu0 %v3525_v6  ;;  %3079 = vmatprep.mubr.msk.f32.mxu0 %vm3448_vm0, %v3449_v11 }
0x14f9   :  { %3308 = vmatprep.subr.bf16.mxu0 %v3446_v5 }
0x14fc   :  { %3310 = vmatpush3.bf16.msra.mxu0 %v3538_v10 }
0x14fd   :  { %3317 = vmatprep.subr.bf16.mxu0 %v3446_v5 }
0x15ca   :  { %v1651_v23 = vpop.f32.mrb[14].mxu0 }
0x15cb   :  { %v1652_v63 = vadd.f32 %v3898_v21, %v1651_v23  ;;  %v3061_v1 = vpop.f32.mrb[15].mxu0 }
0x15cd   :  { %v1739_v3 = vmax.f32 %v1652_v63, 0.0  ;;  %3069 = vmatmul.mubr.msk.f32.vlgmr.msra.gmra.mrb[18].mxu1 %vm264_vm1, %v1652_v63 }
0x15ce   :  { %3313 = vmatpush3.bf16.msra.mxu1 %v3570_v33  ;;  %3090 = vmatprep.mubr.msk.f32.mxu1 %vm3448_vm0, %v3449_v11 }
0x15cf   :  { %3080 = vmatmul.mubr.msk.f32.vlgmr.msra.gmra.mrb[16].mxu0 %vm264_vm1, %v1739_v3  ;;  %3314 = vmatprep.subr.bf16.mxu1 %v3446_v5 }
0x15d0   :  { %3319 = vmatpush3.bf16.msra.mxu0 %v3603_v41  ;;  %3101 = vmatprep.mubr.msk.f32.mxu0 %vm3448_vm0, %v3449_v11 }
0x15d1   :  { %3320 = vmatprep.subr.bf16.mxu0 %v3446_v5 }
0x15d2   :  { %3316 = vmatpush3.bf16.msra.mxu1 %v3580_v37 }
0x15d3   :  { %3323 = vmatprep.subr.bf16.mxu1 %v3446_v5 }
0x15d4   :  { %3322 = vmatpush3.bf16.msra.mxu0 %v3609_v43 }
0x15d5   :  { %3091 = vmatmul.mubr.msk.f32.vlgmr.msra.gmra.mrb[20].mxu1 %vm264_vm1, %v3821_v15  ;;  %3329 = vmatprep.subr.bf16.mxu0 %v3446_v5 }
0x15d6   :  { %3325 = vmatpush3.bf16.msra.mxu1 %v3794_v60  ;;  %3112 = vmatprep.mubr.msk.f32.mxu1 %vm3448_vm0, %v3449_v11 }
0x15d7   :  { %3326 = vmatprep.subr.bf16.mxu1 %v3446_v5 }
0x15da   :  { %3328 = vmatpush3.bf16.msra.mxu1 %v3800_v62 }
0x15db   :  { %3335 = vmatprep.subr.bf16.mxu1 %v3446_v5 }
0x16a0   :  { %v1733_v22 = vpop.f32.mrb[18].mxu1 }
0x16a1   :  { %1738 = vst.msk [vmem:[%s4031_s11] sm:$0xff] %vm1737_vm3, %v1733_v22  ;;  %v3070_v4 = vpop.f32.mrb[19].mxu1 }
0x16a2   :  { %v1809_v9 = vpop.f32.mrb[16].mxu0 }
0x16a3   :  { %v3081_v12 = vpop.f32.mrb[17].mxu0  ;;  %v1810_v13 = vadd.f32 %v3617_v46, %v1809_v9 }
0x16a8   :  { %v1879_v15 = vpop.f32.mrb[20].mxu1 }
0x16a9   :  { %v1883_v17 = vadd.f32 %v1879_v15, %v1810_v13  ;;  %v3092_v18 = vpop.f32.mrb[21].mxu1 }
0x16ab   :  { %v2710_v20 = vmul.f32 -1.442695, %v1883_v17 }
0x16ad   :  { %3432 = vpow2.f32 %v2710_v20 }
0x16b7   :  { %v3433_v24 = vpop.eup %3432 }
0x16b8   :  { %v1887_v25 = vadd.f32 1.0, %v3433_v24 }
0x16ba   :  { %3434 = vrcp.f32 %v1887_v25 }
0x16c4   :  { %v3435_v27 = vpop.eup %3434 }
0x16c5   :  { %1891 = vrot.lane.b32.xlu0 %v3435_v27, %s3451_s6  ;;  %v1976_v35 = vsub.f32 1.0, %v3435_v27 }
0x16c7   :  { %v1977_v36 = vmul.f32 %v1976_v35, %v3817_v14 }
0x1737   :  { %v1892_v28 = vpop.permute.xlu0 %1891 }
0x1738   :  { %v1894_v0 = vmul.f32 %v1892_v28, %v3817_v14 }
0x173a   :  { %1896 = vrot.lane.b32.xlu1 %v1894_v0, %s3452_s28 }
0x17ac   :  { %v1897_v29 = vpop.permute.xlu1 %1896 }
0x17ad   :  { %3102 = vmatmul.mubr.msk.f32.vlgmr.msra.gmra.mrb[18].mxu0 %vm264_vm1, %v1897_v29 }
0x17ae   :  { %3331 = vmatpush3.bf16.msra.mxu0 %v3812_v8  ;;  %3123 = vmatprep.mubr.msk.f32.mxu0 %vm3448_vm0, %v3449_v11 }
0x17af   :  { %3332 = vmatprep.subr.bf16.mxu0 %v3446_v5 }
0x17b2   :  { %3334 = vmatpush3.bf16.msra.mxu0 %v3833_v19 }
0x17b3   :  { %3339 = vmatprep.subr.bf16.mxu0 %v3446_v5 }
0x1880   :  { %v1966_v30 = vpop.f32.mrb[18].mxu0 }
0x1881   :  { %1971 = vrot.lane.b32.xlu0 %v1966_v30, %s3450_s5  ;;  %v3103_v31 = vpop.f32.mrb[19].mxu0 }
0x18f3   :  { %v1972_v2 = vpop.permute.xlu0 %1971 }
0x18f4   :  { %v1974_v7 = vadd.f32 %v1972_v2, %v1810_v13 }
0x18f6   :  { %3436 = vtanh.f32 %v1974_v7 }
0x1900   :  { %v3437_v32 = vpop.eup %3436 }
0x1901   :  { %v1978_v34 = vmul.f32 %v3437_v32, %v1892_v28 }
0x1903   :  { %1980 = vrot.lane.b32.xlu1 %v1978_v34, %s3452_s28 }
0x1975   :  { %v1981_v38 = vpop.permute.xlu1 %1980 }
0x1976   :  { %v3941_v39 = vadd.f32 %v1981_v38, %v1977_v36 }
0x1978   :  { %1985 = vrot.lane.b32.xlu0 %v3941_v39, %s3452_s28 }
0x19ea   :  { %v1986_v40 = vpop.permute.xlu0 %1985 }
0x19eb   :  { %3113 = vmatmul.mubr.msk.f32.vlgmr.msra.gmra.mrb[22].mxu1 %vm264_vm1, %v1986_v40 }
0x19ec   :  { %3338 = vmatpush3.bf16.xpose.msk.msra.mxu1 %vm3877_vm2, %v3881_v54  ;;  %3132 = vmatprep.mubr.msk.f32.mxu1 %vm3448_vm0, %v3449_v11 }
0x19ed   :  { %3130 = vmatprep.subr.mxu1 %v3449_v11 }
0x19f4   :  { %3131 = vmatpush3.xpose.msk.msra.mxu1 %vm264_vm1, %v3890_v61 }
0x19f5   :  { %3351 = vmatprep.subr.bf16.mxu1 %v3446_v5 }
0x1abe   :  { %v2055_v14 = vpop.f32.mrb[22].mxu1 }
0x1abf   :  { %v2056_v42 = vadd.f32 %v3856_v26, %v2055_v14  ;;  %v3114_v44 = vpop.f32.mrb[23].mxu1 }
0x1ac1   :  { %v2059_v45 = vmax.f32 %v2056_v42, 0.0 }
0x1ac3   :  { %3124 = vmatmul.mubr.msk.f32.vlgmr.msra.gmra.mrb[20].mxu0 %vm264_vm1, %v2059_v45 }
0x1ac4   :  { %3341 = vmatpush3.bf16.msra.mxu0 %v3525_v6  ;;  %3143 = vmatprep.mubr.msk.f32.mxu0 %vm3448_vm0, %v3449_v11 }
0x1ac5   :  { %3342 = vmatprep.subr.bf16.mxu0 %v3446_v5 }
0x1ac8   :  { %3344 = vmatpush3.bf16.msra.mxu0 %v3538_v10 }
0x1ac9   :  { %3345 = vmatprep.subr.bf16.mxu0 %v3446_v5 }
0x1b96   :  { %v2129_v47 = vpop.f32.mrb[20].mxu0 }
0x1b97   :  { %v2130_v48 = vadd.f32 %v3898_v21, %v2129_v47  ;;  %v3125_v49 = vpop.f32.mrb[21].mxu0 }
0x1b99   :  { %v2207_v50 = vmax.f32 %v2130_v48, 0.0  ;;  %3133 = vmatmul.mubr.msk.f32.vlgmr.msra.gmra.mrb[24].mxu1 %vm264_vm1, %v2130_v48 }
0x1b9a   :  { %3353 = vmatpush3.bf16.msra.mxu1 %v3603_v41  ;;  %3165 = vmatprep.mubr.msk.f32.mxu1 %vm3448_vm0, %v3449_v11 }
0x1b9b   :  { %3144 = vmatmul.mubr.msk.f32.vlgmr.msra.gmra.mrb[22].mxu0 %vm264_vm1, %v2207_v50  ;;  %3354 = vmatprep.subr.bf16.mxu1 %v3446_v5 }
0x1b9c   :  { %3347 = vmatpush3.bf16.msra.mxu0 %v3570_v33  ;;  %3154 = vmatprep.mubr.msk.f32.mxu0 %vm3448_vm0, %v3449_v11 }
0x1b9d   :  { %3348 = vmatprep.subr.bf16.mxu0 %v3446_v5 }
0x1b9e   :  { %3356 = vmatpush3.bf16.msra.mxu1 %v3609_v43 }
0x1b9f   :  { %3363 = vmatprep.subr.bf16.mxu1 %v3446_v5 }
0x1ba0   :  { %3350 = vmatpush3.bf16.msra.mxu0 %v3580_v37 }
0x1ba1   :  { %3357 = vmatprep.subr.bf16.mxu0 %v3446_v5 }
0x1ba3   :  { %3155 = vmatmul.mubr.msk.f32.vlgmr.msra.gmra.mrb[24].mxu0 %vm264_vm1, %v1986_v40 }
0x1ba4   :  { %3359 = vmatpush3.bf16.msra.mxu0 %v3794_v60  ;;  %3176 = vmatprep.mubr.msk.f32.mxu0 %vm3448_vm0, %v3449_v11 }
0x1ba5   :  { %3360 = vmatprep.subr.bf16.mxu0 %v3446_v5 }
0x1ba8   :  { %3362 = vmatpush3.bf16.msra.mxu0 %v3800_v62 }
0x1ba9   :  { %3369 = vmatprep.subr.bf16.mxu0 %v3446_v5 }
0x1c6c   :  { %v2202_v6 = vpop.f32.mrb[24].mxu1 }
0x1c6d   :  { %2206 = vst.msk [vmem:[%s4031_s11 + $0x8] sm:$0xff] %vm1737_vm3, %v2202_v6  ;;  %v3134_v10 = vpop.f32.mrb[25].mxu1 }
0x1c6e   :  { %v2277_v33 = vpop.f32.mrb[22].mxu0 }
0x1c6f   :  { %v3145_v37 = vpop.f32.mrb[23].mxu0  ;;  %v2278_v41 = vadd.f32 %v3617_v46, %v2277_v33 }
0x1c76   :  { %v2347_v43 = vpop.f32.mrb[24].mxu0 }
0x1c77   :  { %v2351_v60 = vadd.f32 %v2347_v43, %v2278_v41  ;;  %v3156_v51 = vpop.f32.mrb[25].mxu0 }
0x1c79   :  { %v2720_v52 = vmul.f32 -1.442695, %v2351_v60 }
0x1c7b   :  { %3438 = vpow2.f32 %v2720_v52 }
0x1c85   :  { %v3439_v55 = vpop.eup %3438 }
0x1c86   :  { %v2355_v62 = vadd.f32 1.0, %v3439_v55 }
0x1c88   :  { %3440 = vrcp.f32 %v2355_v62 }
0x1c92   :  { %v3441_v56 = vpop.eup %3440 }
0x1c93   :  { %2359 = vrot.lane.b32.xlu1 %v3441_v56, %s3451_s6  ;;  %v2444_v22 = vsub.f32 1.0, %v3441_v56 }
0x1d05   :  { %v2360_v57 = vpop.permute.xlu1 %2359 }
0x1d06   :  { %v2362_v16 = vmul.f32 %v2360_v57, %v3941_v39 }
0x1d08   :  { %2364 = vrot.lane.b32.xlu0 %v2362_v16, %s3452_s28 }
0x1d7a   :  { %v2365_v58 = vpop.permute.xlu0 %2364 }
0x1d7b   :  { %3166 = vmatmul.mubr.msk.f32.vlgmr.msra.gmra.mrb[26].mxu1 %vm264_vm1, %v2365_v58 }
0x1d7c   :  { %3365 = vmatpush3.bf16.msra.mxu1 %v3812_v8  ;;  %3187 = vmatprep.mubr.msk.f32.mxu1 %vm3448_vm0, %v3449_v11  ;;  %v2445_v8 = vmul.f32 %v2444_v22, %v3941_v39 }
0x1d7d   :  { %3366 = vmatprep.subr.bf16.mxu1 %v3446_v5 }
0x1d80   :  { %3368 = vmatpush3.bf16.msra.mxu1 %v3833_v19 }
0x1e4e   :  { %v2434_v46 = vpop.f32.mrb[26].mxu1 }
0x1e4f   :  { %2439 = vrot.lane.b32.xlu1 %v2434_v46, %s3450_s5  ;;  %v3167_v59 = vpop.f32.mrb[27].mxu1 }
0x1ec1   :  { %v2440_v23 = vpop.permute.xlu1 %2439 }
0x1ec2   :  { %v2442_v63 = vadd.f32 %v2440_v23, %v2278_v41 }
0x1ec4   :  { %3442 = vtanh.f32 %v2442_v63 }
0x1ece   :  { %v3443_v1 = vpop.eup %3442 }
0x1ecf   :  { %v2446_v3 = vmul.f32 %v3443_v1, %v2360_v57 }
0x1ed1   :  { %2448 = vrot.lane.b32.xlu0 %v2446_v3, %s3452_s28 }
0x1f43   :  { %v2449_v4 = vpop.permute.xlu0 %2448 }
0x1f44   :  { %v2451_v9 = vadd.f32 %v2449_v4, %v2445_v8 }
0x1f46   :  { %2453 = vrot.lane.b32.xlu1 %v2451_v9, %s3452_s28 }
0x1fb8   :  { %v2454_v5 = vpop.permute.xlu1 %2453 }
0x1fb9   :  { %3177 = vmatmul.mubr.msk.f32.vlgmr.msra.gmra.mrb[26].mxu0 %vm264_vm1, %v2454_v5 }
0x1fba   :  { %3372 = vmatpush3.bf16.xpose.msk.msra.mxu0 %vm3877_vm2, %v3881_v54  ;;  %3196 = vmatprep.mubr.msk.f32.mxu0 %vm3448_vm0, %v3449_v11 }
0x1fbb   :  { %3194 = vmatprep.subr.mxu0 %v3449_v11 }
0x1fc2   :  { %3195 = vmatpush3.xpose.msk.msra.mxu0 %vm264_vm1, %v3890_v61 }
0x208c   :  { %v2523_v19 = vpop.f32.mrb[26].mxu0 }
0x208d   :  { %v2524_v12 = vadd.f32 %v3856_v26, %v2523_v19  ;;  %v3178_v13 = vpop.f32.mrb[27].mxu0 }
0x208f   :  { %v2527_v15 = vmax.f32 %v2524_v12, 0.0 }
0x2091   :  { %3188 = vmatmul.mubr.msk.f32.vlgmr.msra.gmra.mrb[28].mxu1 %vm264_vm1, %v2527_v15 }
0x2164   :  { %v2597_v17 = vpop.f32.mrb[28].mxu1 }
0x2165   :  { %v2598_v18 = vadd.f32 %v3898_v21, %v2597_v17  ;;  %v3189_v53 = vpop.f32.mrb[29].mxu1 }
0x2167   :  { %3197 = vmatmul.mubr.msk.f32.vlgmr.msra.gmra.mrb[28].mxu0 %vm264_vm1, %v2598_v18 }
0x223a   :  { %v2670_v54 = vpop.f32.mrb[28].mxu0 }
0x223b   :  { %2674 = vst.msk [vmem:[%s4031_s11 + $0x10] sm:$0xff] %vm1737_vm3, %v2670_v54  ;;  %v3198_v11 = vpop.f32.mrb[29].mxu0 }

</bundles_post_ra>
